<compile_context>
chip_gen: v6e
topology: v6e:2x2x1
jax: 0.10.0
libtpu: 0.0.40
codegen_flags: <defaults>
</compile_context>

<pallas_src>
import functools

import jax
import jax.numpy as jnp
from jax.experimental import pallas as pl
from jax.experimental.pallas import tpu as pltpu


# ----------------------------------------------------------------------------
# wrapper-side constant construction
# ----------------------------------------------------------------------------
def _centered_dft(n, inverse):
    """Complex (n, n) matrix F of the centered (i)DFT, ortho norm, such that
    fftshift((i)fft(ifftshift(v), norm='ortho')) == F @ v."""
    eye = jnp.eye(n, dtype=jnp.complex64)
    x = jnp.fft.ifftshift(eye, axes=0)
    y = (jnp.fft.ifft(x, axis=0, norm="ortho") if inverse
         else jnp.fft.fft(x, axis=0, norm="ortho"))
    return jnp.fft.fftshift(y, axes=0)


def _gauss_planes(m, dtype):
    """[Re, Im, Re+Im] planes (3, n, n) for the Gauss 3-multiply complex matmul."""
    mr = jnp.real(m).astype(jnp.float32)
    mi = jnp.imag(m).astype(jnp.float32)
    return jnp.stack([mr, mi, mr + mi]).astype(dtype)


# ----------------------------------------------------------------------------
# kernel
# ----------------------------------------------------------------------------
def _mynet_block_kernel(pred_ref, orig_ref, sens_ref,
                        fih_ref, miw_ref, ffh_ref, ffw_ref,
                        red_ref, rep_ref,
                        w_ref, b_ref, dc_ref, out_ref, *, H, W, CW, NB):
    f32 = jnp.float32
    cdt = fih_ref.dtype            # MXU operand dtype (bf16 by default)

    # --- hoisted SMEM scalar reads ---
    w00 = w_ref[0, 0]; w01 = w_ref[0, 1]
    w10 = w_ref[1, 0]; w11 = w_ref[1, 1]
    b0 = b_ref[0]; b1 = b_ref[1]
    dc = dc_ref[0]

    def cmm_left(m, xr, xi):
        # (m_r + i m_i) @ (xr + i xi): Gauss 3-multiply.  Elementwise stays in
        # f32 (v5e has no bf16 VALU); cast to `cdt` only at the dots.
        xs = (xr + xi).astype(cdt)
        xr = xr.astype(cdt)
        xi = xi.astype(cdt)
        p1 = jnp.dot(m[0], xr, preferred_element_type=f32)
        p2 = jnp.dot(m[1], xi, preferred_element_type=f32)
        p3 = jnp.dot(m[2], xs, preferred_element_type=f32)
        return p1 - p2, p3 - p1 - p2

    def cmm_right(xr, xi, m):
        # (xr + i xi) @ (m_r + i m_i): Gauss 3-multiply.
        xs = (xr + xi).astype(cdt)
        xr = xr.astype(cdt)
        xi = xi.astype(cdt)
        p1 = jnp.dot(xr, m[0], preferred_element_type=f32)
        p2 = jnp.dot(xi, m[1], preferred_element_type=f32)
        p3 = jnp.dot(xs, m[2], preferred_element_type=f32)
        return p1 - p2, p3 - p1 - p2

    # constant operator planes
    fih = (fih_ref[0], fih_ref[1], fih_ref[2])   # centered iDFT along H
    ffh = (ffh_ref[0], ffh_ref[1], ffh_ref[2])   # centered DFT along H
    ffw = (ffw_ref[0], ffw_ref[1], ffw_ref[2])   # block-diag DFT along W (right-mult)
    red = red_ref[...]                           # (CW, W) stacked identities: coil sum on MXU
    rep = rep_ref[...]                           # (W, CW) tiled identity: coil broadcast on MXU

    sens_r = sens_ref[0, 0]                      # (H, CW) f32, lane-dense
    sens_i = sens_ref[0, 1]

    # ---------------- reduce path ----------------
    # centered iDFT along H, coil-batched (shared by all frequency branches:
    # the W-mask commutes with the H transform).
    tr, ti = cmm_left(fih, pred_ref[0, 0], pred_ref[0, 1])          # (H, CW) f32

    img_r = jnp.zeros((H, W), f32)
    img_i = jnp.zeros((H, W), f32)
    for br in range(NB):    # NB == 1 when the shared affine model lets branches collapse
        mw = (miw_ref[br, 0], miw_ref[br, 1], miw_ref[br, 2])       # block-diag masked iDFT-W
        yr, yi = cmm_right(tr, ti, mw)                              # (H, CW), all coils at once
        # complex_mul(y, conj(sens)) on the full lane-dense tile, f32
        pr = yr * sens_r + yi * sens_i
        pi = yi * sens_r - yr * sens_i
        # coil reduction via stacked-identity matmul (MXU has plenty of slack)
        acc_r = jnp.dot(pr.astype(cdt), red, preferred_element_type=f32)   # (H, W)
        acc_i = jnp.dot(pi.astype(cdt), red, preferred_element_type=f32)
        # linear part of the shared affine model, per branch
        img_r = img_r + (w00 * acc_r + w01 * acc_i)
        img_i = img_i + (w10 * acc_r + w11 * acc_i)
    # bias is added once per torch branch -> 3x in total (exact for both paths)
    img_r = img_r + 3.0 * b0
    img_i = img_i + 3.0 * b1

    # ---------------- expand path ----------------
    # broadcast image to all coil lane-blocks via tiled-identity matmul
    img_r_t = jnp.dot(img_r.astype(cdt), rep, preferred_element_type=f32)  # (H, CW)
    img_i_t = jnp.dot(img_i.astype(cdt), rep, preferred_element_type=f32)
    er = img_r_t * sens_r - img_i_t * sens_i            # complex_mul(img, sens), f32
    ei = img_r_t * sens_i + img_i_t * sens_r
    t2r, t2i = cmm_left(ffh, er, ei)                     # DFT along H, coil-batched
    k_r, k_i = cmm_right(t2r, t2i, ffw)                  # DFT along W, block-diag, full width

    # data-consistency blend; lane-dense (CW-wide) stores
    orig_r = orig_ref[0, 0]
    orig_i = orig_ref[0, 1]
    out_ref[0, 0] = orig_r + dc * (k_r - orig_r)
    out_ref[0, 1] = orig_i + dc * (k_i - orig_i)


# ----------------------------------------------------------------------------
# public wrapper
# ----------------------------------------------------------------------------
@functools.partial(jax.jit, static_argnames=("collapse_affine",))
def mynet_block_forward(pred_kspace, origin_kspace, sens_maps,
                        model_w, model_b, dc_weight, *, collapse_affine=True):
    """myNetBlock forward.  Inputs in fastMRI layout (B, C, H, W, 2), float32."""
    B, C, H, W, _ = pred_kspace.shape
    CW = C * W
    op_dtype = jnp.bfloat16   # TODO(synk): use f32 operators at real fastMRI sizes if needed

    # frequency-band masks along W (same arithmetic as the torch code)
    boundary, boundary2 = 16, 32
    low = jnp.zeros((W,), jnp.float32).at[
        (W - boundary) // 2: boundary + (W - boundary) // 2].set(1.0)
    mid = jnp.zeros((W,), jnp.float32).at[
        (W - boundary2) // 2: boundary2 + (W - boundary2) // 2].set(1.0)
    mid = mid - low
    high = 1.0 - mid

    # H-direction transform is a left matmul (F @ X); W-direction a right matmul
    # (X @ F.T).  The per-branch W-mask is folded into the W matrix, and the W
    # matrices are block-diagonalized over coils so each W transform is a single
    # (H, C*W) @ (C*W, C*W) matmul covering every coil at once.
    fiw_t = _centered_dft(W, inverse=True).T
    ffw_t = _centered_dft(W, inverse=False).T
    if collapse_affine:
        # model1/2/3 alias one affine module, so the three branches sum to
        # W_model @ sens_reduce(pred * (high+mid+low)) + 3*b.
        # (high+mid+low == 1 + low: the centre band is counted twice — faithful
        #  to the torch code.)
        branch_masks = [high + mid + low]
    else:
        branch_masks = [high, mid, low]
    NB = len(branch_masks)

    eye_c = jnp.eye(C, dtype=jnp.complex64)

    def block_diag_c(m):           # C copies of (W, W) on the diagonal -> (CW, CW)
        return jnp.kron(eye_c, m)

    miw3 = jnp.stack([_gauss_planes(block_diag_c(m[:, None] * fiw_t), op_dtype)
                      for m in branch_masks])                      # (NB, 3, CW, CW)
    ffw3 = _gauss_planes(block_diag_c(ffw_t), op_dtype)            # (3, CW, CW)
    fih3 = _gauss_planes(_centered_dft(H, inverse=True), op_dtype)
    ffh3 = _gauss_planes(_centered_dft(H, inverse=False), op_dtype)

    eye_w = jnp.eye(W, dtype=jnp.float32)
    red = jnp.tile(eye_w, (C, 1)).astype(op_dtype)   # (CW, W): coil-sum reducer
    rep = jnp.tile(eye_w, (1, C)).astype(op_dtype)   # (W, CW): coil broadcaster

    # layout: (B, C, H, W, 2) -> (B, 2, H, C*W).  Coils concatenated along lanes
    # so all matmuls / elementwise work / stores are lane-dense (C*W lanes).
    def to_k(x):
        return jnp.transpose(x, (0, 4, 2, 1, 3)).reshape(B, 2, H, CW).astype(jnp.float32)

    pred_k = to_k(pred_kspace)
    orig_k = to_k(origin_kspace)
    sens_k = to_k(sens_maps)

    kernel = functools.partial(_mynet_block_kernel, H=H, W=W, CW=CW, NB=NB)

    data_spec = pl.BlockSpec((1, 2, H, CW), lambda b: (b, 0, 0, 0))

    def const_spec(shape):
        n = len(shape)
        # grid-invariant operators: single-buffered (no double-buffer VMEM waste)
        return pl.BlockSpec(shape, lambda b: (0,) * n,
                            pipeline_mode=pl.Buffered(1))

    smem_spec = pl.BlockSpec(memory_space=pltpu.MemorySpace.SMEM)

    # VMEM limit derived from actual operand footprints (not hard-coded), clamped
    # to the smallest physical VMEM across generations (v7x: 64 MiB).
    itemsize = jnp.dtype(op_dtype).itemsize
    slab_bytes = 4 * 2 * (2 * H * CW * 4)                         # 4 slabs, double-buffered, f32
    const_bytes = int(miw3.size + ffw3.size + fih3.size + ffh3.size
                      + red.size + rep.size) * itemsize
    scratch_bytes = 16 * H * CW * 4                               # headroom for f32 temporaries
    vmem_limit = int(min(max(slab_bytes + const_bytes + scratch_bytes + (4 << 20),
                             16 << 20), 64 << 20))

    out = pl.pallas_call(
        kernel,
        out_shape=jax.ShapeDtypeStruct((B, 2, H, CW), jnp.float32),
        grid_spec=pltpu.PrefetchScalarGridSpec(
            num_scalar_prefetch=0,
            grid=(B,),   # TODO(synk): add a second 'parallel' coil-group axis for v7x dual-TC
            in_specs=[data_spec, data_spec, data_spec,
                      const_spec((3, H, H)), const_spec((NB, 3, CW, CW)),
                      const_spec((3, H, H)), const_spec((3, CW, CW)),
                      const_spec((CW, W)), const_spec((W, CW)),
                      smem_spec, smem_spec, smem_spec],
            out_specs=data_spec,
        ),
        compiler_params=pltpu.CompilerParams(
            dimension_semantics=("parallel",),
            vmem_limit_bytes=vmem_limit,
        ),
    )(pred_k, orig_k, sens_k, fih3, miw3, ffh3, ffw3, red, rep,
      model_w.astype(jnp.float32), model_b.astype(jnp.float32),
      jnp.reshape(jnp.asarray(dc_weight, jnp.float32), (1,)))

    # back to (B, C, H, W, 2)
    return jnp.transpose(out.reshape(B, 2, H, C, W), (0, 3, 2, 4, 1))


# ----------------------------------------------------------------------------
# pure-JAX reference of the torch forward (f32 FFTs) for the correctness check
# ----------------------------------------------------------------------------
def _ref_forward(pred, orig, sens, model_w, model_b, dc):
    to_c = lambda x: x[..., 0] + 1j * x[..., 1]
    pred_c, orig_c, sens_c = to_c(pred), to_c(orig), to_c(sens)
    W = pred_c.shape[-1]
    low = jnp.zeros((W,)).at[(W - 16) // 2: 16 + (W - 16) // 2].set(1.0)
    mid = jnp.zeros((W,)).at[(W - 32) // 2: 32 + (W - 32) // 2].set(1.0) - low
    high = 1.0 - mid

    def ifft2c(x):
        return jnp.fft.fftshift(jnp.fft.ifft2(
            jnp.fft.ifftshift(x, axes=(-2, -1)), norm="ortho"), axes=(-2, -1))

    def fft2c(x):
        return jnp.fft.fftshift(jnp.fft.fft2(
            jnp.fft.ifftshift(x, axes=(-2, -1)), norm="ortho"), axes=(-2, -1))

    def sens_reduce(x):
        return jnp.sum(ifft2c(x) * jnp.conj(sens_c), axis=1)

    def model(img):
        r, i = jnp.real(img), jnp.imag(img)
        return ((model_w[0, 0] * r + model_w[0, 1] * i + model_b[0])
                + 1j * (model_w[1, 0] * r + model_w[1, 1] * i + model_b[1]))

    img = (model(sens_reduce(pred_c * high[None, None, None, :]))
           + model(sens_reduce(pred_c * mid[None, None, None, :]))
           + model(sens_reduce(pred_c * low[None, None, None, :])))
    out_c = fft2c(img[:, None] * sens_c) * dc + orig_c * (1.0 - dc)
    return jnp.stack([out_c.real, out_c.imag], axis=-1).astype(jnp.float32)


if __name__ == "__main__":
    key = jax.random.PRNGKey(0)
    B, C, H, W = 2, 4, 32, 64
    k1, k2, k3 = jax.random.split(key, 3)
    pred = jax.random.normal(k1, (B, C, H, W, 2), jnp.float32)
    orig = jax.random.normal(k2, (B, C, H, W, 2), jnp.float32)
    sens = jax.random.normal(k3, (B, C, H, W, 2), jnp.float32) * 0.5

    # deterministic parameters: shared affine model + dc_weight = 0.1
    model_w = jnp.array([[0.9, -0.1], [0.1, 0.9]], jnp.float32)
    model_b = jnp.array([0.01, -0.01], jnp.float32)
    dc_weight = jnp.float32(0.1)

    ref = _ref_forward(pred, orig, sens, model_w, model_b, dc_weight)

    # default path: affine branch-collapse (exact for the shared affine model)
    out = jax.block_until_ready(
        mynet_block_forward(pred, orig, sens, model_w, model_b, dc_weight,
                            collapse_affine=True))
    assert out.shape == (B, C, H, W, 2)
    # tolerance relaxed vs. an f32-only kernel: MXU matmuls (DFTs, coil
    # reduce/broadcast) run with bf16 operands and f32 accumulation; errors are
    # further scaled by dc=0.1 at the output.
    err = float(jnp.max(jnp.abs(out - ref)))
    assert err < 3.0e-2, f"collapsed-branch max abs err {err}"

    # flag=False path: 3 explicit branches (for a non-affine model), still with
    # the shared H transform and mask-folded block-diagonal W matrices.
    out3 = jax.block_until_ready(
        mynet_block_forward(pred, orig, sens, model_w, model_b, dc_weight,
                            collapse_affine=False))
    err3 = float(jnp.max(jnp.abs(out3 - ref)))
    assert err3 < 3.0e-2, f"3-branch max abs err {err3}"

    print("KERNEL_OK")
</pallas_src>

<mosaic_0001>
module attributes {stable_mosaic.version = 11 : i64} {
  func.func @_mynet_block_kernel(%arg0: i32, %arg1: memref<1x2x32x256xf32, #tpu.memory_space<vmem>>, %arg2: memref<1x2x32x256xf32, #tpu.memory_space<vmem>>, %arg3: memref<1x2x32x256xf32, #tpu.memory_space<vmem>>, %arg4: memref<3x32x32xbf16, #tpu.memory_space<vmem>>, %arg5: memref<1x3x256x256xbf16, #tpu.memory_space<vmem>>, %arg6: memref<3x32x32xbf16, #tpu.memory_space<vmem>>, %arg7: memref<3x256x256xbf16, #tpu.memory_space<vmem>>, %arg8: memref<256x64xbf16, #tpu.memory_space<vmem>>, %arg9: memref<64x256xbf16, #tpu.memory_space<vmem>>, %arg10: memref<2x2xf32, #tpu.memory_space<smem>>, %arg11: memref<2xf32, #tpu.memory_space<smem>>, %arg12: memref<1xf32, #tpu.memory_space<smem>>, %arg13: memref<1x2x32x256xf32, #tpu.memory_space<vmem>>) attributes {dimension_semantics = [#tpu.dimension_semantics<parallel>], iteration_bounds = array<i64: 2>, scalar_prefetch = 0 : i64, scratch_operands = 0 : i64, tpu.core_type = #tpu.core_type<tc>, window_params = [{transform_indices = @transform_0, window_bounds = array<i64: 1, 2, 32, 256>}, {transform_indices = @transform_1, window_bounds = array<i64: 1, 2, 32, 256>}, {transform_indices = @transform_2, window_bounds = array<i64: 1, 2, 32, 256>}, {pipeline_mode = #tpu.pipeline_mode<synchronous>, transform_indices = @transform_3, window_bounds = array<i64: 3, 32, 32>}, {pipeline_mode = #tpu.pipeline_mode<synchronous>, transform_indices = @transform_4, window_bounds = array<i64: 1, 3, 256, 256>}, {pipeline_mode = #tpu.pipeline_mode<synchronous>, transform_indices = @transform_5, window_bounds = array<i64: 3, 32, 32>}, {pipeline_mode = #tpu.pipeline_mode<synchronous>, transform_indices = @transform_6, window_bounds = array<i64: 3, 256, 256>}, {pipeline_mode = #tpu.pipeline_mode<synchronous>, transform_indices = @transform_7, window_bounds = array<i64: 256, 64>}, {pipeline_mode = #tpu.pipeline_mode<synchronous>, transform_indices = @transform_8, window_bounds = array<i64: 64, 256>}, {transform_indices = @transform_9, window_bounds = array<i64: 2, 2>}, {transform_indices = @transform_10, window_bounds = array<i64: 2>}, {transform_indices = @transform_11, window_bounds = array<i64: 1>}, {transform_indices = @transform_12, window_bounds = array<i64: 1, 2, 32, 256>}]} {
    %c0 = arith.constant 0 : index
    %c0_0 = arith.constant 0 : index
    %0 = memref.load %arg10[%c0, %c0_0] : memref<2x2xf32, #tpu.memory_space<smem>>
    %c0_1 = arith.constant 0 : index
    %c1 = arith.constant 1 : index
    %1 = memref.load %arg10[%c0_1, %c1] : memref<2x2xf32, #tpu.memory_space<smem>>
    %c1_2 = arith.constant 1 : index
    %c0_3 = arith.constant 0 : index
    %2 = memref.load %arg10[%c1_2, %c0_3] : memref<2x2xf32, #tpu.memory_space<smem>>
    %c1_4 = arith.constant 1 : index
    %c1_5 = arith.constant 1 : index
    %3 = memref.load %arg10[%c1_4, %c1_5] : memref<2x2xf32, #tpu.memory_space<smem>>
    %c0_6 = arith.constant 0 : index
    %4 = memref.load %arg11[%c0_6] : memref<2xf32, #tpu.memory_space<smem>>
    %c1_7 = arith.constant 1 : index
    %5 = memref.load %arg11[%c1_7] : memref<2xf32, #tpu.memory_space<smem>>
    %c0_8 = arith.constant 0 : index
    %6 = memref.load %arg12[%c0_8] : memref<1xf32, #tpu.memory_space<smem>>
    %c0_9 = arith.constant 0 : index
    %c0_10 = arith.constant 0 : index
    %c0_11 = arith.constant 0 : index
    %7 = vector.load %arg4[%c0_9, %c0_10, %c0_11] : memref<3x32x32xbf16, #tpu.memory_space<vmem>>, vector<1x32x32xbf16>
    %8 = vector.shape_cast %7 : vector<1x32x32xbf16> to vector<32x32xbf16>
    %c1_12 = arith.constant 1 : index
    %c0_13 = arith.constant 0 : index
    %c0_14 = arith.constant 0 : index
    %9 = vector.load %arg4[%c1_12, %c0_13, %c0_14] : memref<3x32x32xbf16, #tpu.memory_space<vmem>>, vector<1x32x32xbf16>
    %10 = vector.shape_cast %9 : vector<1x32x32xbf16> to vector<32x32xbf16>
    %c2 = arith.constant 2 : index
    %c0_15 = arith.constant 0 : index
    %c0_16 = arith.constant 0 : index
    %11 = vector.load %arg4[%c2, %c0_15, %c0_16] : memref<3x32x32xbf16, #tpu.memory_space<vmem>>, vector<1x32x32xbf16>
    %12 = vector.shape_cast %11 : vector<1x32x32xbf16> to vector<32x32xbf16>
    %c0_17 = arith.constant 0 : index
    %c0_18 = arith.constant 0 : index
    %c0_19 = arith.constant 0 : index
    %13 = vector.load %arg6[%c0_17, %c0_18, %c0_19] : memref<3x32x32xbf16, #tpu.memory_space<vmem>>, vector<1x32x32xbf16>
    %14 = vector.shape_cast %13 : vector<1x32x32xbf16> to vector<32x32xbf16>
    %c1_20 = arith.constant 1 : index
    %c0_21 = arith.constant 0 : index
    %c0_22 = arith.constant 0 : index
    %15 = vector.load %arg6[%c1_20, %c0_21, %c0_22] : memref<3x32x32xbf16, #tpu.memory_space<vmem>>, vector<1x32x32xbf16>
    %16 = vector.shape_cast %15 : vector<1x32x32xbf16> to vector<32x32xbf16>
    %c2_23 = arith.constant 2 : index
    %c0_24 = arith.constant 0 : index
    %c0_25 = arith.constant 0 : index
    %17 = vector.load %arg6[%c2_23, %c0_24, %c0_25] : memref<3x32x32xbf16, #tpu.memory_space<vmem>>, vector<1x32x32xbf16>
    %18 = vector.shape_cast %17 : vector<1x32x32xbf16> to vector<32x32xbf16>
    %c0_26 = arith.constant 0 : index
    %c0_27 = arith.constant 0 : index
    %c0_28 = arith.constant 0 : index
    %19 = vector.load %arg7[%c0_26, %c0_27, %c0_28] : memref<3x256x256xbf16, #tpu.memory_space<vmem>>, vector<1x256x256xbf16>
    %20 = vector.shape_cast %19 : vector<1x256x256xbf16> to vector<256x256xbf16>
    %c1_29 = arith.constant 1 : index
    %c0_30 = arith.constant 0 : index
    %c0_31 = arith.constant 0 : index
    %21 = vector.load %arg7[%c1_29, %c0_30, %c0_31] : memref<3x256x256xbf16, #tpu.memory_space<vmem>>, vector<1x256x256xbf16>
    %22 = vector.shape_cast %21 : vector<1x256x256xbf16> to vector<256x256xbf16>
    %c2_32 = arith.constant 2 : index
    %c0_33 = arith.constant 0 : index
    %c0_34 = arith.constant 0 : index
    %23 = vector.load %arg7[%c2_32, %c0_33, %c0_34] : memref<3x256x256xbf16, #tpu.memory_space<vmem>>, vector<1x256x256xbf16>
    %24 = vector.shape_cast %23 : vector<1x256x256xbf16> to vector<256x256xbf16>
    %c0_35 = arith.constant 0 : index
    %c0_36 = arith.constant 0 : index
    %25 = vector.load %arg8[%c0_35, %c0_36] : memref<256x64xbf16, #tpu.memory_space<vmem>>, vector<256x64xbf16>
    %c0_37 = arith.constant 0 : index
    %c0_38 = arith.constant 0 : index
    %26 = vector.load %arg9[%c0_37, %c0_38] : memref<64x256xbf16, #tpu.memory_space<vmem>>, vector<64x256xbf16>
    %c0_39 = arith.constant 0 : index
    %c0_40 = arith.constant 0 : index
    %c0_41 = arith.constant 0 : index
    %c0_42 = arith.constant 0 : index
    %27 = vector.load %arg3[%c0_39, %c0_40, %c0_41, %c0_42] : memref<1x2x32x256xf32, #tpu.memory_space<vmem>>, vector<1x1x32x256xf32>
    %28 = vector.shape_cast %27 : vector<1x1x32x256xf32> to vector<32x256xf32>
    %c0_43 = arith.constant 0 : index
    %c1_44 = arith.constant 1 : index
    %c0_45 = arith.constant 0 : index
    %c0_46 = arith.constant 0 : index
    %29 = vector.load %arg3[%c0_43, %c1_44, %c0_45, %c0_46] : memref<1x2x32x256xf32, #tpu.memory_space<vmem>>, vector<1x1x32x256xf32>
    %30 = vector.shape_cast %29 : vector<1x1x32x256xf32> to vector<32x256xf32>
    %c0_47 = arith.constant 0 : index
    %c0_48 = arith.constant 0 : index
    %c0_49 = arith.constant 0 : index
    %c0_50 = arith.constant 0 : index
    %31 = vector.load %arg1[%c0_47, %c0_48, %c0_49, %c0_50] : memref<1x2x32x256xf32, #tpu.memory_space<vmem>>, vector<1x1x32x256xf32>
    %32 = vector.shape_cast %31 : vector<1x1x32x256xf32> to vector<32x256xf32>
    %c0_51 = arith.constant 0 : index
    %c1_52 = arith.constant 1 : index
    %c0_53 = arith.constant 0 : index
    %c0_54 = arith.constant 0 : index
    %33 = vector.load %arg1[%c0_51, %c1_52, %c0_53, %c0_54] : memref<1x2x32x256xf32, #tpu.memory_space<vmem>>, vector<1x1x32x256xf32>
    %34 = vector.shape_cast %33 : vector<1x1x32x256xf32> to vector<32x256xf32>
    %35 = arith.addf %32, %34 : vector<32x256xf32>
    %36 = arith.truncf %35 : vector<32x256xf32> to vector<32x256xbf16>
    %37 = arith.truncf %32 : vector<32x256xf32> to vector<32x256xbf16>
    %38 = arith.truncf %34 : vector<32x256xf32> to vector<32x256xbf16>
    %cst = arith.constant dense<0.000000e+00> : vector<32x256xf32>
    %39 = tpu.matmul %8, %37, %cst {dimension_numbers = #tpu.dot_dimension_numbers<[1], [0], [0], [1], [0, 0, 1, 1], [], []>} : vector<32x32xbf16>, vector<32x256xbf16>, vector<32x256xf32> -> vector<32x256xf32>
    %cst_55 = arith.constant dense<0.000000e+00> : vector<32x256xf32>
    %40 = tpu.matmul %10, %38, %cst_55 {dimension_numbers = #tpu.dot_dimension_numbers<[1], [0], [0], [1], [0, 0, 1, 1], [], []>} : vector<32x32xbf16>, vector<32x256xbf16>, vector<32x256xf32> -> vector<32x256xf32>
    %cst_56 = arith.constant dense<0.000000e+00> : vector<32x256xf32>
    %41 = tpu.matmul %12, %36, %cst_56 {dimension_numbers = #tpu.dot_dimension_numbers<[1], [0], [0], [1], [0, 0, 1, 1], [], []>} : vector<32x32xbf16>, vector<32x256xbf16>, vector<32x256xf32> -> vector<32x256xf32>
    %42 = arith.subf %39, %40 : vector<32x256xf32>
    %43 = arith.subf %41, %39 : vector<32x256xf32>
    %44 = arith.subf %43, %40 : vector<32x256xf32>
    %cst_57 = arith.constant 0.000000e+00 : f32
    %45 = vector.broadcast %cst_57 : f32 to vector<32x64xf32>
    %cst_58 = arith.constant 0.000000e+00 : f32
    %46 = vector.broadcast %cst_58 : f32 to vector<32x64xf32>
    %c0_59 = arith.constant 0 : index
    %c0_60 = arith.constant 0 : index
    %c0_61 = arith.constant 0 : index
    %c0_62 = arith.constant 0 : index
    %47 = vector.load %arg5[%c0_59, %c0_60, %c0_61, %c0_62] : memref<1x3x256x256xbf16, #tpu.memory_space<vmem>>, vector<1x1x256x256xbf16>
    %48 = vector.shape_cast %47 : vector<1x1x256x256xbf16> to vector<256x256xbf16>
    %c0_63 = arith.constant 0 : index
    %c1_64 = arith.constant 1 : index
    %c0_65 = arith.constant 0 : index
    %c0_66 = arith.constant 0 : index
    %49 = vector.load %arg5[%c0_63, %c1_64, %c0_65, %c0_66] : memref<1x3x256x256xbf16, #tpu.memory_space<vmem>>, vector<1x1x256x256xbf16>
    %50 = vector.shape_cast %49 : vector<1x1x256x256xbf16> to vector<256x256xbf16>
    %c0_67 = arith.constant 0 : index
    %c2_68 = arith.constant 2 : index
    %c0_69 = arith.constant 0 : index
    %c0_70 = arith.constant 0 : index
    %51 = vector.load %arg5[%c0_67, %c2_68, %c0_69, %c0_70] : memref<1x3x256x256xbf16, #tpu.memory_space<vmem>>, vector<1x1x256x256xbf16>
    %52 = vector.shape_cast %51 : vector<1x1x256x256xbf16> to vector<256x256xbf16>
    %53 = arith.addf %42, %44 : vector<32x256xf32>
    %54 = arith.truncf %53 : vector<32x256xf32> to vector<32x256xbf16>
    %55 = arith.truncf %42 : vector<32x256xf32> to vector<32x256xbf16>
    %56 = arith.truncf %44 : vector<32x256xf32> to vector<32x256xbf16>
    %cst_71 = arith.constant dense<0.000000e+00> : vector<32x256xf32>
    %57 = tpu.matmul %55, %48, %cst_71 {dimension_numbers = #tpu.dot_dimension_numbers<[1], [0], [0], [1], [0, 0, 1, 1], [], []>} : vector<32x256xbf16>, vector<256x256xbf16>, vector<32x256xf32> -> vector<32x256xf32>
    %cst_72 = arith.constant dense<0.000000e+00> : vector<32x256xf32>
    %58 = tpu.matmul %56, %50, %cst_72 {dimension_numbers = #tpu.dot_dimension_numbers<[1], [0], [0], [1], [0, 0, 1, 1], [], []>} : vector<32x256xbf16>, vector<256x256xbf16>, vector<32x256xf32> -> vector<32x256xf32>
    %cst_73 = arith.constant dense<0.000000e+00> : vector<32x256xf32>
    %59 = tpu.matmul %54, %52, %cst_73 {dimension_numbers = #tpu.dot_dimension_numbers<[1], [0], [0], [1], [0, 0, 1, 1], [], []>} : vector<32x256xbf16>, vector<256x256xbf16>, vector<32x256xf32> -> vector<32x256xf32>
    %60 = arith.subf %57, %58 : vector<32x256xf32>
    %61 = arith.subf %59, %57 : vector<32x256xf32>
    %62 = arith.subf %61, %58 : vector<32x256xf32>
    %63 = arith.mulf %60, %28 : vector<32x256xf32>
    %64 = arith.mulf %62, %30 : vector<32x256xf32>
    %65 = arith.addf %63, %64 : vector<32x256xf32>
    %66 = arith.mulf %62, %28 : vector<32x256xf32>
    %67 = arith.mulf %60, %30 : vector<32x256xf32>
    %68 = arith.subf %66, %67 : vector<32x256xf32>
    %69 = arith.truncf %65 : vector<32x256xf32> to vector<32x256xbf16>
    %cst_74 = arith.constant dense<0.000000e+00> : vector<32x64xf32>
    %70 = tpu.matmul %69, %25, %cst_74 {dimension_numbers = #tpu.dot_dimension_numbers<[1], [0], [0], [1], [0, 0, 1, 1], [], []>} : vector<32x256xbf16>, vector<256x64xbf16>, vector<32x64xf32> -> vector<32x64xf32>
    %71 = arith.truncf %68 : vector<32x256xf32> to vector<32x256xbf16>
    %cst_75 = arith.constant dense<0.000000e+00> : vector<32x64xf32>
    %72 = tpu.matmul %71, %25, %cst_75 {dimension_numbers = #tpu.dot_dimension_numbers<[1], [0], [0], [1], [0, 0, 1, 1], [], []>} : vector<32x256xbf16>, vector<256x64xbf16>, vector<32x64xf32> -> vector<32x64xf32>
    %73 = vector.broadcast %0 : f32 to vector<32x64xf32>
    %74 = arith.mulf %73, %70 : vector<32x64xf32>
    %75 = vector.broadcast %1 : f32 to vector<32x64xf32>
    %76 = arith.mulf %75, %72 : vector<32x64xf32>
    %77 = arith.addf %74, %76 : vector<32x64xf32>
    %78 = arith.addf %45, %77 : vector<32x64xf32>
    %79 = vector.broadcast %2 : f32 to vector<32x64xf32>
    %80 = arith.mulf %79, %70 : vector<32x64xf32>
    %81 = vector.broadcast %3 : f32 to vector<32x64xf32>
    %82 = arith.mulf %81, %72 : vector<32x64xf32>
    %83 = arith.addf %80, %82 : vector<32x64xf32>
    %84 = arith.addf %46, %83 : vector<32x64xf32>
    %cst_76 = arith.constant 3.000000e+00 : f32
    %85 = arith.mulf %cst_76, %4 : f32
    %86 = vector.broadcast %85 : f32 to vector<32x64xf32>
    %87 = arith.addf %78, %86 : vector<32x64xf32>
    %cst_77 = arith.constant 3.000000e+00 : f32
    %88 = arith.mulf %cst_77, %5 : f32
    %89 = vector.broadcast %88 : f32 to vector<32x64xf32>
    %90 = arith.addf %84, %89 : vector<32x64xf32>
    %91 = arith.truncf %87 : vector<32x64xf32> to vector<32x64xbf16>
    %cst_78 = arith.constant dense<0.000000e+00> : vector<32x256xf32>
    %92 = tpu.matmul %91, %26, %cst_78 {dimension_numbers = #tpu.dot_dimension_numbers<[1], [0], [0], [1], [0, 0, 1, 1], [], []>} : vector<32x64xbf16>, vector<64x256xbf16>, vector<32x256xf32> -> vector<32x256xf32>
    %93 = arith.truncf %90 : vector<32x64xf32> to vector<32x64xbf16>
    %cst_79 = arith.constant dense<0.000000e+00> : vector<32x256xf32>
    %94 = tpu.matmul %93, %26, %cst_79 {dimension_numbers = #tpu.dot_dimension_numbers<[1], [0], [0], [1], [0, 0, 1, 1], [], []>} : vector<32x64xbf16>, vector<64x256xbf16>, vector<32x256xf32> -> vector<32x256xf32>
    %95 = arith.mulf %92, %28 : vector<32x256xf32>
    %96 = arith.mulf %94, %30 : vector<32x256xf32>
    %97 = arith.subf %95, %96 : vector<32x256xf32>
    %98 = arith.mulf %92, %30 : vector<32x256xf32>
    %99 = arith.mulf %94, %28 : vector<32x256xf32>
    %100 = arith.addf %98, %99 : vector<32x256xf32>
    %101 = arith.addf %97, %100 : vector<32x256xf32>
    %102 = arith.truncf %101 : vector<32x256xf32> to vector<32x256xbf16>
    %103 = arith.truncf %97 : vector<32x256xf32> to vector<32x256xbf16>
    %104 = arith.truncf %100 : vector<32x256xf32> to vector<32x256xbf16>
    %cst_80 = arith.constant dense<0.000000e+00> : vector<32x256xf32>
    %105 = tpu.matmul %14, %103, %cst_80 {dimension_numbers = #tpu.dot_dimension_numbers<[1], [0], [0], [1], [0, 0, 1, 1], [], []>} : vector<32x32xbf16>, vector<32x256xbf16>, vector<32x256xf32> -> vector<32x256xf32>
    %cst_81 = arith.constant dense<0.000000e+00> : vector<32x256xf32>
    %106 = tpu.matmul %16, %104, %cst_81 {dimension_numbers = #tpu.dot_dimension_numbers<[1], [0], [0], [1], [0, 0, 1, 1], [], []>} : vector<32x32xbf16>, vector<32x256xbf16>, vector<32x256xf32> -> vector<32x256xf32>
    %cst_82 = arith.constant dense<0.000000e+00> : vector<32x256xf32>
    %107 = tpu.matmul %18, %102, %cst_82 {dimension_numbers = #tpu.dot_dimension_numbers<[1], [0], [0], [1], [0, 0, 1, 1], [], []>} : vector<32x32xbf16>, vector<32x256xbf16>, vector<32x256xf32> -> vector<32x256xf32>
    %108 = arith.subf %105, %106 : vector<32x256xf32>
    %109 = arith.subf %107, %105 : vector<32x256xf32>
    %110 = arith.subf %109, %106 : vector<32x256xf32>
    %111 = arith.addf %108, %110 : vector<32x256xf32>
    %112 = arith.truncf %111 : vector<32x256xf32> to vector<32x256xbf16>
    %113 = arith.truncf %108 : vector<32x256xf32> to vector<32x256xbf16>
    %114 = arith.truncf %110 : vector<32x256xf32> to vector<32x256xbf16>
    %cst_83 = arith.constant dense<0.000000e+00> : vector<32x256xf32>
    %115 = tpu.matmul %113, %20, %cst_83 {dimension_numbers = #tpu.dot_dimension_numbers<[1], [0], [0], [1], [0, 0, 1, 1], [], []>} : vector<32x256xbf16>, vector<256x256xbf16>, vector<32x256xf32> -> vector<32x256xf32>
    %cst_84 = arith.constant dense<0.000000e+00> : vector<32x256xf32>
    %116 = tpu.matmul %114, %22, %cst_84 {dimension_numbers = #tpu.dot_dimension_numbers<[1], [0], [0], [1], [0, 0, 1, 1], [], []>} : vector<32x256xbf16>, vector<256x256xbf16>, vector<32x256xf32> -> vector<32x256xf32>
    %cst_85 = arith.constant dense<0.000000e+00> : vector<32x256xf32>
    %117 = tpu.matmul %112, %24, %cst_85 {dimension_numbers = #tpu.dot_dimension_numbers<[1], [0], [0], [1], [0, 0, 1, 1], [], []>} : vector<32x256xbf16>, vector<256x256xbf16>, vector<32x256xf32> -> vector<32x256xf32>
    %118 = arith.subf %115, %116 : vector<32x256xf32>
    %119 = arith.subf %117, %115 : vector<32x256xf32>
    %120 = arith.subf %119, %116 : vector<32x256xf32>
    %c0_86 = arith.constant 0 : index
    %c0_87 = arith.constant 0 : index
    %c0_88 = arith.constant 0 : index
    %c0_89 = arith.constant 0 : index
    %121 = vector.load %arg2[%c0_86, %c0_87, %c0_88, %c0_89] : memref<1x2x32x256xf32, #tpu.memory_space<vmem>>, vector<1x1x32x256xf32>
    %122 = vector.shape_cast %121 : vector<1x1x32x256xf32> to vector<32x256xf32>
    %c0_90 = arith.constant 0 : index
    %c1_91 = arith.constant 1 : index
    %c0_92 = arith.constant 0 : index
    %c0_93 = arith.constant 0 : index
    %123 = vector.load %arg2[%c0_90, %c1_91, %c0_92, %c0_93] : memref<1x2x32x256xf32, #tpu.memory_space<vmem>>, vector<1x1x32x256xf32>
    %124 = vector.shape_cast %123 : vector<1x1x32x256xf32> to vector<32x256xf32>
    %125 = arith.subf %118, %122 : vector<32x256xf32>
    %126 = vector.broadcast %6 : f32 to vector<32x256xf32>
    %127 = arith.mulf %126, %125 : vector<32x256xf32>
    %128 = arith.addf %122, %127 : vector<32x256xf32>
    %c0_94 = arith.constant 0 : index
    %c0_95 = arith.constant 0 : index
    %c0_96 = arith.constant 0 : index
    %c0_97 = arith.constant 0 : index
    %129 = vector.load %arg13[%c0_94, %c0_95, %c0_96, %c0_97] : memref<1x2x32x256xf32, #tpu.memory_space<vmem>>, vector<1x1x32x256xf32>
    %130 = vector.shape_cast %129 : vector<1x1x32x256xf32> to vector<32x256xf32>
    %131 = vector.shape_cast %128 : vector<32x256xf32> to vector<1x1x32x256xf32>
    tpu.vector_store %arg13[%c0_94, %c0_95, %c0_96, %c0_97], %131 {strides = array<i32>} : memref<1x2x32x256xf32, #tpu.memory_space<vmem>>, vector<1x1x32x256xf32>,
    %132 = arith.subf %120, %124 : vector<32x256xf32>
    %133 = vector.broadcast %6 : f32 to vector<32x256xf32>
    %134 = arith.mulf %133, %132 : vector<32x256xf32>
    %135 = arith.addf %124, %134 : vector<32x256xf32>
    %c0_98 = arith.constant 0 : index
    %c1_99 = arith.constant 1 : index
    %c0_100 = arith.constant 0 : index
    %c0_101 = arith.constant 0 : index
    %136 = vector.load %arg13[%c0_98, %c1_99, %c0_100, %c0_101] : memref<1x2x32x256xf32, #tpu.memory_space<vmem>>, vector<1x1x32x256xf32>
    %137 = vector.shape_cast %136 : vector<1x1x32x256xf32> to vector<32x256xf32>
    %138 = vector.shape_cast %135 : vector<32x256xf32> to vector<1x1x32x256xf32>
    tpu.vector_store %arg13[%c0_98, %c1_99, %c0_100, %c0_101], %138 {strides = array<i32>} : memref<1x2x32x256xf32, #tpu.memory_space<vmem>>, vector<1x1x32x256xf32>,
    return
  }
  func.func @transform_0(%arg0: i32) -> (i32, i32, i32, i32) {
    %c0_i32 = arith.constant 0 : i32
    %c0_i32_0 = arith.constant 0 : i32
    %c0_i32_1 = arith.constant 0 : i32
    %c0_i32_2 = arith.constant 0 : i32
    return %arg0, %c0_i32, %c0_i32_0, %c0_i32_1 : i32, i32, i32, i32
  }
  func.func @transform_1(%arg0: i32) -> (i32, i32, i32, i32) {
    %c0_i32 = arith.constant 0 : i32
    %c0_i32_0 = arith.constant 0 : i32
    %c0_i32_1 = arith.constant 0 : i32
    %c0_i32_2 = arith.constant 0 : i32
    return %arg0, %c0_i32, %c0_i32_0, %c0_i32_1 : i32, i32, i32, i32
  }
  func.func @transform_2(%arg0: i32) -> (i32, i32, i32, i32) {
    %c0_i32 = arith.constant 0 : i32
    %c0_i32_0 = arith.constant 0 : i32
    %c0_i32_1 = arith.constant 0 : i32
    %c0_i32_2 = arith.constant 0 : i32
    return %arg0, %c0_i32, %c0_i32_0, %c0_i32_1 : i32, i32, i32, i32
  }
  func.func @transform_3(%arg0: i32) -> (i32, i32, i32) {
    %c0_i32 = arith.constant 0 : i32
    %c0_i32_0 = arith.constant 0 : i32
    %c0_i32_1 = arith.constant 0 : i32
    %c0_i32_2 = arith.constant 0 : i32
    return %c0_i32, %c0_i32_0, %c0_i32_1 : i32, i32, i32
  }
  func.func @transform_4(%arg0: i32) -> (i32, i32, i32, i32) {
    %c0_i32 = arith.constant 0 : i32
    %c0_i32_0 = arith.constant 0 : i32
    %c0_i32_1 = arith.constant 0 : i32
    %c0_i32_2 = arith.constant 0 : i32
    %c0_i32_3 = arith.constant 0 : i32
    return %c0_i32, %c0_i32_0, %c0_i32_1, %c0_i32_2 : i32, i32, i32, i32
  }
  func.func @transform_5(%arg0: i32) -> (i32, i32, i32) {
    %c0_i32 = arith.constant 0 : i32
    %c0_i32_0 = arith.constant 0 : i32
    %c0_i32_1 = arith.constant 0 : i32
    %c0_i32_2 = arith.constant 0 : i32
    return %c0_i32, %c0_i32_0, %c0_i32_1 : i32, i32, i32
  }
  func.func @transform_6(%arg0: i32) -> (i32, i32, i32) {
    %c0_i32 = arith.constant 0 : i32
    %c0_i32_0 = arith.constant 0 : i32
    %c0_i32_1 = arith.constant 0 : i32
    %c0_i32_2 = arith.constant 0 : i32
    return %c0_i32, %c0_i32_0, %c0_i32_1 : i32, i32, i32
  }
  func.func @transform_7(%arg0: i32) -> (i32, i32) {
    %c0_i32 = arith.constant 0 : i32
    %c0_i32_0 = arith.constant 0 : i32
    %c0_i32_1 = arith.constant 0 : i32
    return %c0_i32, %c0_i32_0 : i32, i32
  }
  func.func @transform_8(%arg0: i32) -> (i32, i32) {
    %c0_i32 = arith.constant 0 : i32
    %c0_i32_0 = arith.constant 0 : i32
    %c0_i32_1 = arith.constant 0 : i32
    return %c0_i32, %c0_i32_0 : i32, i32
  }
  func.func @transform_9(%arg0: i32) -> (i32, i32) {
    %c0_i32 = arith.constant 0 : i32
    %c0_i32_0 = arith.constant 0 : i32
    %c0_i32_1 = arith.constant 0 : i32
    return %c0_i32, %c0_i32_0 : i32, i32
  }
  func.func @transform_10(%arg0: i32) -> i32 {
    %c0_i32 = arith.constant 0 : i32
    %c0_i32_0 = arith.constant 0 : i32
    return %c0_i32 : i32
  }
  func.func @transform_11(%arg0: i32) -> i32 {
    %c0_i32 = arith.constant 0 : i32
    %c0_i32_0 = arith.constant 0 : i32
    return %c0_i32 : i32
  }
  func.func @transform_12(%arg0: i32) -> (i32, i32, i32, i32) {
    %c0_i32 = arith.constant 0 : i32
    %c0_i32_0 = arith.constant 0 : i32
    %c0_i32_1 = arith.constant 0 : i32
    %c0_i32_2 = arith.constant 0 : i32
    return %arg0, %c0_i32, %c0_i32_0, %c0_i32_1 : i32, i32, i32, i32
  }
}

</mosaic_0001>

<bundles_post_ra>
// kernel: mynet_block_forward.1
= control target key start
LH: loop header
LB: loop body
LE: loop exit
PB: predicated region body
PF: predicated region fallthrough
CT: control target
= control target key end

     0   :  { %s5499_s0 = inlined_call_operand.vmem [shape: f32[2,2,32,256], index: 0, kind: input, shape index: {}]   ;;  %s5500_s1 = inlined_call_operand.vmem [shape: f32[2,2,32,256], index: 1, kind: input, shape index: {}]   ;;  %s5501_s2 = inlined_call_operand.vmem [shape: f32[2,2,32,256], index: 2, kind: input, shape index: {}]   ;;  %s5502_s3 = inlined_call_operand.vmem [shape: bf16[3,32,32], index: 3, kind: input, shape index: {}]   ;;  %s5503_s4 = inlined_call_operand.vmem [shape: bf16[1,3,256,256], index: 4, kind: input, shape index: {}]   ;;  %s5504_s5 = inlined_call_operand.vmem [shape: bf16[3,32,32], index: 5, kind: input, shape index: {}]   ;;  %s5505_s6 = inlined_call_operand.vmem [shape: bf16[3,256,256], index: 6, kind: input, shape index: {}]   ;;  %s5506_s7 = inlined_call_operand.vmem [shape: bf16[256,64], index: 7, kind: input, shape index: {}]   ;;  %s5507_s8 = inlined_call_operand.vmem [shape: bf16[64,256], index: 8, kind: input, shape index: {}]   ;;  %s5508_s9 = inlined_call_operand.vmem [shape: f32[2,2], index: 9, kind: input, shape index: {}]   ;;  %s5509_s10 = inlined_call_operand.vmem [shape: f32[2], index: 10, kind: input, shape index: {}]   ;;  %s5510_s11 = inlined_call_operand.<no memory space> [shape: f32[1], index: 11, kind: input, shape index: {}]   ;;  %s5511_s12 = inlined_call_operand.vmem [shape: f32[2,2,32,256], index: 12, kind: output, shape index: {}]  }
   0x1   :  { %17 = sst [smem:[#allocation2]] %s5510_s11 }
   0x2   :  { %18 = vsyncpa [#allocation4], 0 }
   0x3   :  { %19 = vsyncpa [#allocation6], 0  ;;  %s4328_s23 = smov 0  }
   0x4 LB: > { %s4334_s24 = sadd.s32 4294967295, %s4255_s23   ;;  %p3352_p0 = scmp.ge.s32.totalorder %s4255_s23, 1  ;;  %s4255_s23 = sphi %s4328_s23, %s25_s23  }
   0x5   : > { %p323_p1 = scmp.lt.s32.totalorder %s4255_s23, 3  ;;  %s354_s26 = sshll.u32 %s5508_s9, 4  ;;  %s355_s26 = int_to_ptr.vmem [resolvable:$true] %s354_s26 }
   0x6   : > { %p5512_p3 = scmp.eq.s32.totalorder %s4334_s24, 0  ;;  %s365_s30 = sshll.u32 %s5509_s10, 4  ;;  %s366_s30 = int_to_ptr.vmem [resolvable:$true] %s365_s30 }
   0x7   : > { %p4341_p2 = pnand %p3352_p0, %p323_p1  ;;  %s4211_s14 = scalar_lea.vmem %s355_s26, 32 }
   0x8   : > { %p4212_p6 = scmp.ne.s32.totalorder %s355_s26, %s4211_s14  ;;  %p4219_p10 = scmp.lt.s32.totalorder %s355_s26, %s355_s26 }
   0x9   : > { %s5514_s27 = scalar_select %p4341_p2, 1, 0 }
   0xa   : > { %p3861_p4 = pneg %p4341_p2  ;;  %p4220_p11 = scmp.lt.s32.totalorder %s4211_s14, %s4211_s14 }
   0xc   : > { %p4353_p5 = pnand %p5512_p3, %p3861_p4  ;;  %p4221_p12 = por %p4220_p11, %p4219_p10 }
   0xe   : > { %p4213_p7 = pneg %p4353_p5 }
  0x10   : > { %p4214_p8 = pnand %p4213_p7, %p4212_p6 }
  0x12   : > { %p4215_p9 = pneg %p4214_p8 }
  0x14   : > { %p4222_p13 = pnand %p4221_p12, %p4215_p9 }
  0x16   : > { %4225 = shalt.err (!%p4222_p13)
}
  0x17   : > { %s4257_s15 = smov [#allocation3]   ;;  %s4226_s16 = scalar_lea.vmem %s366_s30, 16 }
  0x18   : > { %3864 = dma.vmem_to_smem (!%p4353_p5), %s355_s26, 32, %s4257_s15, [#allocation4]  }
  0x19   : > { %p4227_p0 = scmp.ne.s32.totalorder %s366_s30, %s4226_s16  ;;  %p4234_p3 = scmp.lt.s32.totalorder %s366_s30, %s366_s30 }
  0x1a   : > { %p4235_p2 = scmp.lt.s32.totalorder %s4226_s16, %s4226_s16 }
  0x1b   : > { %p4229_p1 = pnand %p4227_p0, %p4213_p7 }
  0x1c   : > { %p4236_p6 = por %p4235_p2, %p4234_p3 }
  0x1d   : > { %p4230_p4 = pneg %p4229_p1 }
  0x1f   : > { %p4237_p8 = pnand %p4236_p6, %p4230_p4 }
  0x21   : > { %4240 = shalt.err (!%p4237_p8)
}
  0x22   : > { %s4258_s17 = smov [#allocation5]   ;;  %p5516_p9 = scmp.ne.s32.totalorder %s5514_s27, 0 }
  0x23   : > { %3867 = dma.vmem_to_smem (!%p4353_p5), %s366_s30, 16, %s4258_s17, [#allocation6]  }
  0x24   : > { %405 = sbr.rel (%p5516_p9) target bundleno = 1462 (0x5b6), region = 68  ;;  %p5517_p10 = scmp.eq.s32.totalorder (!%p5516_p9), %s4334_s24, 0 }
  0x29   : > { %4246 = dma.done.wait (%p5517_p10), [#allocation4], 32   ;;  %p5518_p11 = pmov %p5517_p10 }
  0x2a   : > { %p5519_p7 = pmov %p5517_p10 }
  0x2b   : > { %4248 = vsyncadd (%p5518_p11), [#allocation4], 4294967264 }
  0x2c   : > { %4250 = dma.done.wait (%p5519_p7), [#allocation6], 16   ;;  %p5520_p2 = pmov %p5519_p7 }
  0x2e   : > { %4252 = vsyncadd (%p5520_p2), [#allocation6], 4294967280 }
  0x2f   : > { %415 = sfence }
  0x30   : > { %p462_p3 = scmp.lt.s32.totalorder %s4334_s24, 1  ;;  %v4259_v0 = vmov 0   ;;  %v3891_v32 = vld [vmem:[%s5503_s4 + $0x74] ss:$8 sps:$4 sm:$0xff]   ;;  %v3883_v33 = vld [vmem:[%s5502_s3] sm:$0xff]   ;;  %vm720_vm0 = vcmask 261120  }
  0x31   : > { %759 = vmatprep.mubr.bf16.mxu0 %v4259_v0  ;;  %828 = vmatprep.mubr.bf16.mxu1 %v4259_v0  ;;  %v3884_v34 = vld [vmem:[%s5502_s3 + $0x10] sm:$0xff]   ;;  %v3894_v40 = vld [vmem:[%s5503_s4 + $0x64] ss:$8 sps:$4 sm:$0xff]   ;;  %v3892_v43 = vld [vmem:[%s5503_s4 + $0x60] ss:$8 sps:$4 sm:$0xff]   ;;  %s3367_s25 = sld [smem:[#allocation3 + $0x1]] }
  0x32   : > { %s5522_s24 = smov (!%p462_p3, %s4334_s24), 1  ;;  %v3889_v39 = vld [vmem:[%s5503_s4 + $0x70] ss:$8 sps:$4 sm:$0xff]   ;;  %v3885_v41 = vld [vmem:[%s5502_s3 + $0x8] sm:$0xff]   ;;  %v3906_v44 = vld [vmem:[%s5503_s4 + $0x174] ss:$8 sps:$4 sm:$0xff]  }
  0x33   : > { %s4377_s18 = sshll.u32 %s5522_s24, 7  ;;  %v3897_v45 = vld [vmem:[%s5503_s4 + $0x54] ss:$8 sps:$4 sm:$0xff]   ;;  %v3895_v47 = vld [vmem:[%s5503_s4 + $0x50] ss:$8 sps:$4 sm:$0xff]   ;;  %v3886_v49 = vld [vmem:[%s5502_s3 + $0x20] sm:$0xff]  }
  0x34   : > { %s4383_s21 = scalar_lea.vmem %s5499_s0, %s4377_s18  ;;  %v3887_v46 = vld [vmem:[%s5502_s3 + $0x18] sm:$0xff]   ;;  %v3900_v48 = vld [vmem:[%s5503_s4 + $0x44] ss:$8 sps:$4 sm:$0xff]   ;;  %v3898_v50 = vld [vmem:[%s5503_s4 + $0x40] ss:$8 sps:$4 sm:$0xff]   ;;  %s4831_s22 = scalar_lea.vmem %s5501_s2, %s4377_s18  ;;  %vm2063_vm1 = vcmask 523264  }
  0x35   : > { %v678_v1 = vld [vmem:[%s4383_s21 + $0x28] sm:$0xff]  ;;  %v680_v2 = vld [vmem:[%s4383_s21 + $0x38] sm:$0xff]  ;;  %v677_v7 = vld [vmem:[%s4383_s21 + $0x20] sm:$0xff]  ;;  %s3368_s24 = sld [smem:[#allocation3 + $0x80]]  ;;  %s5380_s15 = scalar_lea.vmem %s5500_s1, %s4377_s18 }
  0x36   : > { %v3464_v3 = vld [vmem:[%s4383_s21 + $0x68] sm:$0xff]  ;;  %v705_v4 = vpack.c.bf16 %v680_v2, %v678_v1  ;;  %v3466_v5 = vld [vmem:[%s4383_s21 + $0x78] sm:$0xff]  ;;  %v679_v8 = vld [vmem:[%s4383_s21 + $0x30] sm:$0xff]  ;;  %s3369_s11 = sld [smem:[#allocation3 + $0x81]]  ;;  %s5410_s19 = scalar_lea.vmem %s5511_s12, %s4377_s18 }
  0x37   : > { %v695_v6 = vadd.f32 %v3464_v3, %v678_v1  ;;  %v697_v9 = vadd.f32 %v3466_v5, %v680_v2  ;;  %v709_v10 = vpack.c.bf16 %v3466_v5, %v3464_v3  ;;  %v704_v11 = vpack.c.bf16 %v679_v8, %v677_v7  ;;  %v3463_v12 = vld [vmem:[%s4383_s21 + $0x60] sm:$0xff]  ;;  %v3465_v13 = vld [vmem:[%s4383_s21 + $0x70] sm:$0xff]  ;;  %v674_v14 = vld [vmem:[%s4383_s21 + $0x8] sm:$0xff]  ;;  %s4956_s26 = sld [smem:[#allocation5]] }
  0x38   : > { %739 = vmatprep.subr.bf16.mxu0 %v705_v4  ;;  %v708_v15 = vpack.c.bf16 %v3465_v13, %v3463_v12  ;;  %v676_v16 = vld [vmem:[%s4383_s21 + $0x18] sm:$0xff]  ;;  %v3460_v17 = vld [vmem:[%s4383_s21 + $0x48] sm:$0xff]  ;;  %v673_v21 = vld [vmem:[%s4383_s21] sm:$0xff]  ;;  %v694_v24 = vadd.f32 %v3463_v12, %v677_v7  ;;  %v696_v25 = vadd.f32 %v3465_v13, %v679_v8  ;;  %s4958_s27 = sld [smem:[#allocation5 + $0x1]] }
  0x39   : > { %v3462_v18 = vld [vmem:[%s4383_s21 + $0x58] sm:$0xff]  ;;  %808 = vmatprep.subr.bf16.mxu1 %v709_v10  ;;  %740 = vmatpush1.bf16.msra.mxu0 %v704_v11  ;;  %v703_v19 = vpack.c.bf16 %v676_v16, %v674_v14  ;;  %v675_v22 = vld [vmem:[%s4383_s21 + $0x10] sm:$0xff]  ;;  %v3459_v23 = vld [vmem:[%s4383_s21 + $0x40] sm:$0xff]  ;;  %v701_v28 = vpack.c.bf16 %v697_v9, %v695_v6  ;;  %v691_v30 = vadd.f32 %v3460_v17, %v674_v14  ;;  %s489_s30 = sld [smem:[#allocation2]] }
  0x3a   : > { %v707_v20 = vpack.c.bf16 %v3462_v18, %v3460_v17  ;;  %809 = vmatpush1.bf16.msra.mxu1 %v708_v15  ;;  %v702_v26 = vpack.c.bf16 %v675_v22, %v673_v21  ;;  %v3461_v27 = vld [vmem:[%s4383_s21 + $0x50] sm:$0xff]  ;;  %v693_v31 = vadd.f32 %v3462_v18, %v676_v16  ;;  %v700_v35 = vpack.c.bf16 %v696_v25, %v694_v24  ;;  %v3912_v53 = vld [vmem:[%s5503_s4 + $0x164] ss:$8 sps:$4 sm:$0xff]   ;;  %v3910_v56 = vld [vmem:[%s5503_s4 + $0x160] ss:$8 sps:$4 sm:$0xff]  }
  0x3b   : > { %741 = vmatprep.subr.bf16.mxu0 %v703_v19  ;;  %v706_v29 = vpack.c.bf16 %v3461_v27, %v3459_v23  ;;  %v690_v36 = vadd.f32 %v3459_v23, %v673_v21  ;;  %v692_v37 = vadd.f32 %v3461_v27, %v675_v22  ;;  %v3903_v51 = vld [vmem:[%s5503_s4 + $0x34] ss:$8 sps:$4 sm:$0xff]   ;;  %v3904_v52 = vld [vmem:[%s5503_s4 + $0x170] ss:$8 sps:$4 sm:$0xff]   ;;  %v3909_v55 = vld [vmem:[%s5503_s4 + $0x24] ss:$8 sps:$4 sm:$0xff]  }
  0x3c   : > { %810 = vmatprep.subr.bf16.mxu1 %v707_v20  ;;  %v699_v38 = vpack.c.bf16 %v693_v31, %v691_v30  ;;  %v3901_v54 = vld [vmem:[%s5503_s4 + $0x30] ss:$8 sps:$4 sm:$0xff]   ;;  %v3918_v57 = vld [vmem:[%s5503_s4 + $0x154] ss:$8 sps:$4 sm:$0xff]   ;;  %v3888_v58 = vld [vmem:[%s5502_s3 + $0x28] sm:$0xff]  }
  0x3d   : > { %742 = vmatpush1.bf16.msra.mxu0 %v702_v26  ;;  %v698_v42 = vpack.c.bf16 %v692_v37, %v690_v36  ;;  %v3907_v59 = vld [vmem:[%s5503_s4 + $0x20] ss:$8 sps:$4 sm:$0xff]   ;;  %v3915_v60 = vld [vmem:[%s5503_s4 + $0x14] ss:$8 sps:$4 sm:$0xff]   ;;  %v3916_v61 = vld [vmem:[%s5503_s4 + $0x150] ss:$8 sps:$4 sm:$0xff]  }
  0x3e   : > { %811 = vmatpush1.bf16.msra.mxu1 %v706_v29  ;;  %877 = vmatprep.subr.bf16.mxu0 %v701_v28  ;;  %v3924_v62 = vld [vmem:[%s5503_s4 + $0x144] ss:$8 sps:$4 sm:$0xff]   ;;  %v3913_v63 = vld [vmem:[%s5503_s4 + $0x10] ss:$8 sps:$4 sm:$0xff]   ;;  %v3922_v2 = vld [vmem:[%s5503_s4 + $0x140] ss:$8 sps:$4 sm:$0xff]  }
  0x3f   : > { %1220 = vmatprep.subr.bf16.mxu1 %v3891_v32  ;;  %v3921_v1 = vld [vmem:[%s5503_s4 + $0x4] ss:$8 sps:$4 sm:$0xff]   ;;  %v3919_v3 = vld [vmem:[%s5503_s4] ss:$8 sps:$4 sm:$0xff]   ;;  %v3930_v4 = vld [vmem:[%s5503_s4 + $0x134] ss:$8 sps:$4 sm:$0xff]  }
  0x40   : > { %3469 = vmatmul.mubr.msk.bf16.vlgmr.msra.gmra.mxu0 %vm720_vm0, %v3883_v33  ;;  %v3927_v5 = vld [vmem:[%s5503_s4 + $0xf4] ss:$8 sps:$4 sm:$0xff]   ;;  %v3928_v6 = vld [vmem:[%s5503_s4 + $0x130] ss:$8 sps:$4 sm:$0xff]   ;;  %v3936_v7 = vld [vmem:[%s5503_s4 + $0x124] ss:$8 sps:$4 sm:$0xff]  }
  0x41   : > { %3473 = vmatmul.mubr.msk.bf16.vlgmr.msra.gmra.mxu1 %vm720_vm0, %v3884_v34  ;;  %769 = vmatprep.mubr.bf16.mxu0 %v4259_v0  ;;  %v3925_v8 = vld [vmem:[%s5503_s4 + $0xf0] ss:$8 sps:$4 sm:$0xff]   ;;  %v3933_v9 = vld [vmem:[%s5503_s4 + $0xe4] ss:$8 sps:$4 sm:$0xff]   ;;  %v3934_v10 = vld [vmem:[%s5503_s4 + $0x120] ss:$8 sps:$4 sm:$0xff]  }
  0x42   : > { %878 = vmatpush1.bf16.msra.mxu0 %v700_v35  ;;  %838 = vmatprep.mubr.bf16.mxu1 %v4259_v0  ;;  %v3942_v11 = vld [vmem:[%s5503_s4 + $0x114] ss:$8 sps:$4 sm:$0xff]   ;;  %v3931_v12 = vld [vmem:[%s5503_s4 + $0xe0] ss:$8 sps:$4 sm:$0xff]   ;;  %v3940_v14 = vld [vmem:[%s5503_s4 + $0x110] ss:$8 sps:$4 sm:$0xff]  }
  0x43   : > { %879 = vmatprep.subr.bf16.mxu0 %v699_v38  ;;  %1221 = vmatpush1.bf16.msra.mxu1 %v3889_v39  ;;  %v3939_v13 = vld [vmem:[%s5503_s4 + $0xd4] ss:$8 sps:$4 sm:$0xff]   ;;  %v3948_v15 = vld [vmem:[%s5503_s4 + $0x104] ss:$8 sps:$4 sm:$0xff]   ;;  %v3937_v16 = vld [vmem:[%s5503_s4 + $0xd0] ss:$8 sps:$4 sm:$0xff]  }
  0x44   : > { %1222 = vmatprep.subr.bf16.mxu1 %v3894_v40  ;;  %v3945_v17 = vld [vmem:[%s5503_s4 + $0xc4] ss:$8 sps:$4 sm:$0xff]   ;;  %v3946_v18 = vld [vmem:[%s5503_s4 + $0x100] ss:$8 sps:$4 sm:$0xff]   ;;  %v3954_v19 = vld [vmem:[%s5503_s4 + $0x1f4] ss:$8 sps:$4 sm:$0xff]  }
  0x45   : > { %v3943_v20 = vld [vmem:[%s5503_s4 + $0xc0] ss:$8 sps:$4 sm:$0xff]   ;;  %v3951_v21 = vld [vmem:[%s5503_s4 + $0xb4] ss:$8 sps:$4 sm:$0xff]   ;;  %v3952_v22 = vld [vmem:[%s5503_s4 + $0x1f0] ss:$8 sps:$4 sm:$0xff]  }
  0x46   : > { %880 = vmatpush1.bf16.msra.mxu0 %v698_v42  ;;  %v3949_v23 = vld [vmem:[%s5503_s4 + $0xb0] ss:$8 sps:$4 sm:$0xff]   ;;  %v3957_v24 = vld [vmem:[%s5503_s4 + $0xa4] ss:$8 sps:$4 sm:$0xff]   ;;  %v3955_v25 = vld [vmem:[%s5503_s4 + $0xa0] ss:$8 sps:$4 sm:$0xff]  }
  0x47   : > { %1223 = vmatpush1.bf16.msra.mxu1 %v3892_v43  ;;  %1433 = vmatprep.subr.bf16.mxu0 %v3906_v44  ;;  %v3960_v26 = vld [vmem:[%s5503_s4 + $0x1e4] ss:$8 sps:$4 sm:$0xff]   ;;  %v3958_v27 = vld [vmem:[%s5503_s4 + $0x1e0] ss:$8 sps:$4 sm:$0xff]   ;;  %v3963_v28 = vld [vmem:[%s5503_s4 + $0x94] ss:$8 sps:$4 sm:$0xff]  }
  0x48   : > { %3470 = vmatmul.mubr.msk.bf16.gmra.mxu0 %vm720_vm0, %v3885_v41  ;;  %1224 = vmatprep.subr.bf16.mxu1 %v3897_v45  ;;  %v3961_v29 = vld [vmem:[%s5503_s4 + $0x90] ss:$8 sps:$4 sm:$0xff]   ;;  %v3966_v30 = vld [vmem:[%s5503_s4 + $0x1d4] ss:$8 sps:$4 sm:$0xff]   ;;  %v3969_v32 = vld [vmem:[%s5503_s4 + $0x84] ss:$8 sps:$4 sm:$0xff]  }
  0x49   : > { %897 = vmatprep.mubr.bf16.mxu0 %v4259_v0  ;;  %3474 = vmatmul.mubr.msk.bf16.gmra.mxu1 %vm720_vm0, %v3887_v46  ;;  %v3964_v31 = vld [vmem:[%s5503_s4 + $0x1d0] ss:$8 sps:$4 sm:$0xff]   ;;  %v3967_v33 = vld [vmem:[%s5503_s4 + $0x80] ss:$8 sps:$4 sm:$0xff]   ;;  %v3972_v34 = vld [vmem:[%s5503_s4 + $0x1c4] ss:$8 sps:$4 sm:$0xff]  }
  0x4a   : > { %v3970_v35 = vld [vmem:[%s5503_s4 + $0x1c0] ss:$8 sps:$4 sm:$0xff]   ;;  %v3975_v36 = vld [vmem:[%s5503_s4 + $0x274] ss:$8 sps:$4 sm:$0xff]   ;;  %v3976_v37 = vld [vmem:[%s5503_s4 + $0x1b0] ss:$8 sps:$4 sm:$0xff]  }
  0x4b   : > { %1225 = vmatpush1.bf16.msra.mxu1 %v3895_v47  ;;  %v3978_v38 = vld [vmem:[%s5503_s4 + $0x1b4] ss:$8 sps:$4 sm:$0xff]   ;;  %v3984_v39 = vld [vmem:[%s5503_s4 + $0x1a4] ss:$8 sps:$4 sm:$0xff]   ;;  %v3982_v40 = vld [vmem:[%s5503_s4 + $0x1a0] ss:$8 sps:$4 sm:$0xff]  }
  0x4c   : > { %1226 = vmatprep.subr.bf16.mxu1 %v3900_v48  ;;  %v3990_v41 = vld [vmem:[%s5503_s4 + $0x194] ss:$8 sps:$4 sm:$0xff]   ;;  %v3988_v42 = vld [vmem:[%s5503_s4 + $0x190] ss:$8 sps:$4 sm:$0xff]   ;;  %v3996_v43 = vld [vmem:[%s5503_s4 + $0x184] ss:$8 sps:$4 sm:$0xff]  }
  0x4d   : > { %v3994_v44 = vld [vmem:[%s5503_s4 + $0x180] ss:$8 sps:$4 sm:$0xff]   ;;  %s2009_s28 = smul.f32 3.0, %s4956_s26 }
  0x4e   : > { %s2015_s29 = smul.f32 3.0, %s4958_s27 }
  0x4f   : > { %1227 = vmatpush1.bf16.msra.mxu1 %v3898_v50 }
  0x50   : > { %3477 = vmatmul.mubr.msk.bf16.vlgmr.msra.gmra.mxu0 %vm720_vm0, %v3886_v49  ;;  %1228 = vmatprep.subr.bf16.mxu1 %v3903_v51 }
  0x51   : > { %907 = vmatprep.mubr.bf16.mxu0 %v4259_v0  ;;  %1434 = vmatpush1.bf16.msra.mxu0 %v3904_v52 }
  0x52   : > { %1435 = vmatprep.subr.bf16.mxu0 %v3912_v53 }
  0x53   : > { %1229 = vmatpush1.bf16.msra.mxu1 %v3901_v54 }
  0x54   : > { %1230 = vmatprep.subr.bf16.mxu1 %v3909_v55 }
  0x55   : > { %1436 = vmatpush1.bf16.msra.mxu0 %v3910_v56 }
  0x56   : > { %1437 = vmatprep.subr.bf16.mxu0 %v3918_v57 }
  0x57   : > { %1231 = vmatpush1.bf16.msra.mxu1 %v3907_v59 }
  0x58   : > { %3478 = vmatmul.mubr.msk.bf16.gmra.mxu0 %vm720_vm0, %v3888_v58  ;;  %1232 = vmatprep.subr.bf16.mxu1 %v3915_v60 }
  0x59   : > { %1438 = vmatpush1.bf16.msra.mxu0 %v3916_v61  ;;  %v3973_v61 = vld [vmem:[%s5503_s4 + $0x270] ss:$8 sps:$4 sm:$0xff]  }
  0x5a   : > { %1439 = vmatprep.subr.bf16.mxu0 %v3924_v62 }
  0x5b   : > { %1233 = vmatpush1.bf16.msra.mxu1 %v3913_v63  ;;  %v3981_v63 = vld [vmem:[%s5503_s4 + $0x264] ss:$8 sps:$4 sm:$0xff]  }
  0x5c   : > { %1234 = vmatprep.subr.bf16.mxu1 %v3921_v1 }
  0x5d   : > { %1440 = vmatpush1.bf16.msra.mxu0 %v3922_v2 }
  0x5e   : > { %1441 = vmatprep.subr.bf16.mxu0 %v3930_v4 }
  0x5f   : > { %1235 = vmatpush1.bf16.msra.mxu1 %v3919_v3 }
  0x60   : > { %1236 = vmatprep.subr.bf16.mxu1 %v3927_v5 }
  0x61   : > { %1442 = vmatpush1.bf16.msra.mxu0 %v3928_v6  ;;  %v3979_v6 = vld [vmem:[%s5503_s4 + $0x260] ss:$8 sps:$4 sm:$0xff]  }
  0x62   : > { %1443 = vmatprep.subr.bf16.mxu0 %v3936_v7 }
  0x63   : > { %1237 = vmatpush2.bf16.msra.mxu1 %v3925_v8 }
  0x64   : > { %1238 = vmatprep.subr.bf16.mxu1 %v3933_v9  ;;  %v3987_v9 = vld [vmem:[%s5503_s4 + $0x254] ss:$8 sps:$4 sm:$0xff]  }
  0x65   : > { %1444 = vmatpush1.bf16.msra.mxu0 %v3934_v10 }
  0x66   : > { %1445 = vmatprep.subr.bf16.mxu0 %v3942_v11 }
  0x67   : > { %1239 = vmatpush2.bf16.msra.mxu1 %v3931_v12 }
  0x68   : > { %1240 = vmatprep.subr.bf16.mxu1 %v3939_v13 }
  0x69   : > { %1446 = vmatpush1.bf16.msra.mxu0 %v3940_v14 }
  0x6a   : > { %1447 = vmatprep.subr.bf16.mxu0 %v3948_v15  ;;  %v3985_v15 = vld [vmem:[%s5503_s4 + $0x250] ss:$8 sps:$4 sm:$0xff]  }
  0x6b   : > { %1241 = vmatpush2.bf16.msra.mxu1 %v3937_v16 }
  0x6c   : > { %1242 = vmatprep.subr.bf16.mxu1 %v3945_v17 }
  0x6d   : > { %1448 = vmatpush1.bf16.msra.mxu0 %v3946_v18  ;;  %v3993_v18 = vld [vmem:[%s5503_s4 + $0x244] ss:$8 sps:$4 sm:$0xff]  }
  0x6e   : > { %1449 = vmatprep.subr.bf16.mxu0 %v3954_v19 }
  0x6f   : > { %1243 = vmatpush2.bf16.msra.mxu1 %v3943_v20 }
  0x70   : > { %1244 = vmatprep.subr.bf16.mxu1 %v3951_v21 }
  0x71   : > { %1450 = vmatpush2.bf16.msra.mxu0 %v3952_v22 }
  0x72   : > { %1451 = vmatprep.subr.bf16.mxu0 %v3960_v26  ;;  %v3999_v26 = vld [vmem:[%s5503_s4 + $0x234] ss:$8 sps:$4 sm:$0xff]  }
  0x73   : > { %1245 = vmatpush2.bf16.msra.mxu1 %v3949_v23  ;;  %v3991_v23 = vld [vmem:[%s5503_s4 + $0x240] ss:$8 sps:$4 sm:$0xff]  }
  0x74   : > { %1246 = vmatprep.subr.bf16.mxu1 %v3957_v24 }
  0x75   : > { %1452 = vmatpush2.bf16.msra.mxu0 %v3958_v27 }
  0x76   : > { %1453 = vmatprep.subr.bf16.mxu0 %v3966_v30 }
  0x77   : > { %1247 = vmatpush2.bf16.msra.mxu1 %v3955_v25 }
  0x78   : > { %1248 = vmatprep.subr.bf16.mxu1 %v3963_v28 }
  0x79   : > { %1454 = vmatpush2.bf16.msra.mxu0 %v3964_v31  ;;  %v3997_v31 = vld [vmem:[%s5503_s4 + $0x230] ss:$8 sps:$4 sm:$0xff]  }
  0x7a   : > { %1455 = vmatprep.subr.bf16.mxu0 %v3972_v34 }
  0x7b   : > { %1249 = vmatpush2.bf16.msra.mxu1 %v3961_v29 }
  0x7c   : > { %1250 = vmatprep.subr.bf16.mxu1 %v3969_v32 }
  0x7d   : > { %1456 = vmatpush2.bf16.msra.mxu0 %v3970_v35 }
  0x7e   : > { %1457 = vmatprep.subr.bf16.mxu0 %v3978_v38 }
  0x7f   : > { %1251 = vmatpush2.bf16.msra.mxu1 %v3967_v33 }
  0x80   : > { %1646 = vmatprep.subr.bf16.mxu1 %v3975_v36 }
  0x81   : > { %1458 = vmatpush2.bf16.msra.mxu0 %v3976_v37  ;;  %v4002_v37 = vld [vmem:[%s5503_s4 + $0x224] ss:$8 sps:$4 sm:$0xff]  }
  0x82   : > { %1459 = vmatprep.subr.bf16.mxu0 %v3984_v39 }
  0x85   : > { %1460 = vmatpush2.bf16.msra.mxu0 %v3982_v40 }
  0x86   : > { %1461 = vmatprep.subr.bf16.mxu0 %v3990_v41 }
  0x89   : > { %1462 = vmatpush2.bf16.msra.mxu0 %v3988_v42 }
  0x8a   : > { %1463 = vmatprep.subr.bf16.mxu0 %v3996_v43  ;;  %v4000_v43 = vld [vmem:[%s5503_s4 + $0x220] ss:$8 sps:$4 sm:$0xff]  }
  0x8d   : > { %1464 = vmatpush2.bf16.msra.mxu0 %v3994_v44 }
 0x100   : > { %v761_v45 = vpop.f32.mrf.mxu0 }
 0x101   : > { %v830_v46 = vpop.f32.mrf.mxu1 }
 0x102   : > { %v763_v47 = vpop.f32.mrf.mxu0  ;;  %v4628_v57 = vsub.f32 %v761_v45, %v830_v46 }
 0x103   : > { %v832_v48 = vpop.f32.mrf.mxu1 }
 0x104   : > { %v765_v49 = vpop.f32.mrf.mxu0  ;;  %v919_v54 = vsub.f32 %v763_v47, %v832_v48 }
 0x105   : > { %v834_v50 = vpop.f32.mrf.mxu1 }
 0x106   : > { %v767_v51 = vpop.f32.mrf.mxu0  ;;  %v4624_v52 = vsub.f32 %v765_v49, %v834_v50 }
 0x107   : > { %v836_v53 = vpop.f32.mrf.mxu1 }
 0x108   : > { %v921_v55 = vsub.f32 %v767_v51, %v836_v53  ;;  %v4626_v56 = vpop.f32.mrf.mxu0  ;;  %v1052_v62 = vpack.c.bf16 %v4624_v52, %v4628_v57 }
 0x109   : > { %v4630_v58 = vpop.f32.mrf.mxu1 }
 0x10a   : > { %v1053_v59 = vpack.c.bf16 %v921_v55, %v919_v54  ;;  %v4632_v60 = vpop.f32.mrf.mxu0  ;;  %v4648_v3 = vsub.f32 %v4626_v56, %v4630_v58 }
 0x10b   : > { %v4642_v1 = vpop.f32.mrf.mxu1 }
 0x10c   : > { %1252 = vmatprep.mubr.bf16.mxu1 %v1053_v59  ;;  %v4644_v2 = vpop.f32.mrf.mxu0  ;;  %v4655_v7 = vsub.f32 %v4632_v60, %v4642_v1  ;;  %v4009_v59 = vld [vmem:[%s5503_s4 + $0x2f0] ss:$8 sps:$4 sm:$0xff]  }
 0x10d   : > { %1253 = vmatmul.mubr.bf16.vlgmr.msra.gmra.mxu1 %v1052_v62  ;;  %v844_v4 = vpop.f32.mrf.mxu1  ;;  %v4017_v62 = vld [vmem:[%s5503_s4 + $0x2d4] ss:$8 sps:$4 sm:$0xff]  }
 0x10e   : > { %1647 = vmatpush1.bf16.msra.mxu1 %v3973_v61  ;;  %v777_v5 = vpop.f32.mrf.mxu0  ;;  %v4658_v8 = vsub.f32 %v4644_v2, %v844_v4  ;;  %v4012_v61 = vld [vmem:[%s5503_s4 + $0x2e0] ss:$8 sps:$4 sm:$0xff]  }
 0x10f   : > { %1648 = vmatprep.subr.bf16.mxu1 %v3981_v63  ;;  %v846_v10 = vpop.f32.mrf.mxu1  ;;  %v4015_v63 = vld [vmem:[%s5503_s4 + $0x2d0] ss:$8 sps:$4 sm:$0xff]  }
 0x110   : > { %v899_v11 = vpop.f32.mrf.mxu0  ;;  %v4663_v12 = vsub.f32 %v777_v5, %v846_v10  ;;  %v1054_v13 = vpack.c.bf16 %v4658_v8, %v4648_v3 }
 0x111   : > { %v926_v21 = vsub.f32 %v899_v11, %v761_v45  ;;  %v4027_v11 = vld [vmem:[%s5503_s4 + $0x290] ss:$8 sps:$4 sm:$0xff]  }
 0x112   : > { %1649 = vmatpush1.bf16.msra.mxu1 %v3979_v6  ;;  %v901_v14 = vpop.f32.mrf.mxu0  ;;  %v1055_v16 = vpack.c.bf16 %v4663_v12, %v4655_v7  ;;  %v4026_v6 = vld [vmem:[%s5503_s4 + $0x2a4] ss:$8 sps:$4 sm:$0xff]  }
 0x113   : > { %v927_v17 = vsub.f32 %v901_v14, %v763_v47  ;;  %1650 = vmatprep.subr.bf16.mxu1 %v3987_v9  ;;  %v4683_v30 = vsub.f32 %v926_v21, %v830_v46  ;;  %v4005_v46 = vld [vmem:[%s5503_s4 + $0x214] ss:$8 sps:$4 sm:$0xff]   ;;  %v4024_v9 = vld [vmem:[%s5503_s4 + $0x2a0] ss:$8 sps:$4 sm:$0xff]  }
 0x114   : > { %v903_v19 = vpop.f32.mrf.mxu0  ;;  %1262 = vmatprep.mubr.bf16.mxu1 %v1055_v16  ;;  %v4030_v14 = vld [vmem:[%s5503_s4 + $0x280] ss:$8 sps:$4 sm:$0xff]  }
 0x115   : > { %v928_v20 = vsub.f32 %v903_v19, %v765_v49  ;;  %1263 = vmatmul.mubr.bf16.gmra.mxu1 %v1054_v13  ;;  %v935_v24 = vsub.f32 %v927_v17, %v832_v48  ;;  %v4032_v13 = vld [vmem:[%s5503_s4 + $0x284] ss:$8 sps:$4 sm:$0xff]  }
 0x116   : > { %1651 = vmatpush1.bf16.msra.mxu1 %v3985_v15  ;;  %v905_v22 = vpop.f32.mrf.mxu0 }
 0x117   : > { %v929_v25 = vsub.f32 %v905_v22, %v767_v51  ;;  %1652 = vmatprep.subr.bf16.mxu1 %v3993_v18  ;;  %v4681_v27 = vsub.f32 %v928_v20, %v834_v50  ;;  %v1041_v34 = vadd.f32 %v935_v24, %v919_v54  ;;  %v4003_v51 = vld [vmem:[%s5503_s4 + $0x210] ss:$8 sps:$4 sm:$0xff]   ;;  %v4008_v54 = vld [vmem:[%s5503_s4 + $0x204] ss:$8 sps:$4 sm:$0xff]   ;;  %v1040_v18 = vadd.f32 %v4683_v30, %v4628_v57 }
 0x118   : > { %v909_v28 = vpop.f32.mrf.mxu0  ;;  %v4035_v57 = vld [vmem:[%s5506_s7 + $0x70] sm:$0xff]  }
 0x119   : > { %v937_v29 = vsub.f32 %v929_v25, %v836_v53  ;;  %v930_v32 = vsub.f32 %v909_v28, %v4626_v56  ;;  %v1056_v38 = vpack.c.bf16 %v4681_v27, %v4683_v30  ;;  %v4006_v56 = vld [vmem:[%s5503_s4 + $0x200] ss:$8 sps:$4 sm:$0xff]   ;;  %v1042_v15 = vadd.f32 %v4681_v27, %v4624_v52  ;;  %v4033_v52 = vld [vmem:[%s5506_s7 + $0x78] sm:$0xff]   ;;  %v4043_v28 = vld [vmem:[%s5506_s7 + $0x50] sm:$0xff]  }
 0x11a   : > { %1653 = vmatpush1.bf16.msra.mxu1 %v3991_v23  ;;  %v911_v33 = vpop.f32.mrf.mxu0  ;;  %3825 = vmatprep.subr.bf16.mxu0 %v4033_v52  ;;  %v4040_v25 = vld [vmem:[%s5506_s7 + $0x20] sm:$0xff]   ;;  %v4042_v27 = vld [vmem:[%s5506_s7 + $0x18] sm:$0xff]   ;;  %v4045_v30 = vld [vmem:[%s5506_s7 + $0x48] sm:$0xff]  }
 0x11b   : > { %v1043_v35 = vadd.f32 %v937_v29, %v921_v55  ;;  %1654 = vmatprep.subr.bf16.mxu1 %v3999_v26  ;;  %v1057_v36 = vpack.c.bf16 %v937_v29, %v935_v24  ;;  %v931_v39 = vsub.f32 %v911_v33, %v4632_v60  ;;  %v938_v44 = vsub.f32 %v930_v32, %v4630_v58  ;;  %v4011_v58 = vld [vmem:[%s5503_s4 + $0x2f4] ss:$8 sps:$4 sm:$0xff]   ;;  %v4014_v60 = vld [vmem:[%s5503_s4 + $0x2e4] ss:$8 sps:$4 sm:$0xff]  }
 0x11c   : > { %v913_v40 = vpop.f32.mrf.mxu0  ;;  %v1048_v19 = vpack.c.bf16 %v1042_v15, %v1040_v18  ;;  %v4039_v24 = vld [vmem:[%s5506_s7 + $0x60] sm:$0xff]   ;;  %v4041_v26 = vld [vmem:[%s5506_s7 + $0x58] sm:$0xff]   ;;  %v4044_v29 = vld [vmem:[%s5506_s7 + $0x10] sm:$0xff]  }
 0x11d   : > { %1465 = vmatprep.mubr.bf16.mxu0 %v1057_v36  ;;  %v1049_v41 = vpack.c.bf16 %v1043_v35, %v1041_v34  ;;  %v932_v42 = vsub.f32 %v913_v40, %v4644_v2  ;;  %v939_v47 = vsub.f32 %v931_v39, %v4642_v1  ;;  %v4020_v1 = vld [vmem:[%s5503_s4 + $0x2c4] ss:$8 sps:$4 sm:$0xff]   ;;  %v4018_v2 = vld [vmem:[%s5503_s4 + $0x2c0] ss:$8 sps:$4 sm:$0xff]   ;;  %v1044_v21 = vadd.f32 %v938_v44, %v4648_v3  ;;  %v4036_v3 = vld [vmem:[%s5506_s7 + $0x30] sm:$0xff]  }
 0x11e   : > { %1655 = vmatpush1.bf16.msra.mxu1 %v3997_v31  ;;  %1466 = vmatmul.mubr.bf16.vlgmr.msra.gmra.mxu0 %v1056_v38  ;;  %v915_v45 = vpop.f32.mrf.mxu0  ;;  %v4046_v31 = vld [vmem:[%s5506_s7 + $0x8] sm:$0xff]   ;;  %v4047_v32 = vld [vmem:[%s5506_s7 + $0x40] sm:$0xff]  }
 0x11f   : > { %1656 = vmatprep.subr.bf16.mxu1 %v4002_v37  ;;  %1678 = vmatprep.mubr.bf16.mxu1 %v1049_v41  ;;  %v940_v48 = vsub.f32 %v932_v42, %v844_v4  ;;  %v933_v49 = vsub.f32 %v915_v45, %v777_v5  ;;  %v4023_v4 = vld [vmem:[%s5503_s4 + $0x2b4] ss:$8 sps:$4 sm:$0xff]   ;;  %v4021_v5 = vld [vmem:[%s5503_s4 + $0x2b0] ss:$8 sps:$4 sm:$0xff]   ;;  %v1045_v16 = vadd.f32 %v939_v47, %v4655_v7  ;;  %v4048_v33 = vld [vmem:[%s5506_s7] sm:$0xff]  }
 0x120   : > { %v4034_v7 = vld [vmem:[%s5506_s7 + $0x38] sm:$0xff]  }
 0x121   : > { %v941_v50 = vsub.f32 %v933_v49, %v846_v10  ;;  %v1058_v53 = vpack.c.bf16 %v940_v48, %v938_v44  ;;  %v4029_v10 = vld [vmem:[%s5503_s4 + $0x294] ss:$8 sps:$4 sm:$0xff]   ;;  %v1046_v22 = vadd.f32 %v940_v48, %v4658_v8  ;;  %3826 = vmatpush3.bf16.msra.mxu0 %v4034_v7  ;;  %v4037_v8 = vld [vmem:[%s5506_s7 + $0x68] sm:$0xff]  }
 0x122   : > { %1657 = vmatpush1.bf16.msra.mxu1 %v4000_v43  ;;  %3827 = vmatprep.subr.bf16.mxu0 %v4035_v57 }
 0x123   : > { %1658 = vmatprep.subr.bf16.mxu1 %v4005_v46  ;;  %v1059_v55 = vpack.c.bf16 %v941_v50, %v939_v47  ;;  %v1047_v17 = vadd.f32 %v941_v50, %v4663_v12  ;;  %v1050_v23 = vpack.c.bf16 %v1046_v22, %v1044_v21  ;;  %v4038_v12 = vld [vmem:[%s5506_s7 + $0x28] sm:$0xff]   ;;  %v4874_v21 = vld [vmem:[%s4831_s22 + $0x30] sm:$0xff] }
 0x125   : > { %1475 = vmatprep.mubr.bf16.mxu0 %v1059_v55  ;;  %v1051_v20 = vpack.c.bf16 %v1047_v17, %v1045_v16  ;;  %3828 = vmatpush3.bf16.msra.mxu0 %v4036_v3 }
 0x126   : > { %1659 = vmatpush1.bf16.msra.mxu1 %v4003_v51  ;;  %1476 = vmatmul.mubr.bf16.gmra.mxu0 %v1058_v53  ;;  %v4836_v51 = vld [vmem:[%s4831_s22] sm:$0xff] }
 0x127   : > { %1660 = vmatprep.subr.bf16.mxu1 %v4008_v54  ;;  %3829 = vmatprep.subr.bf16.mxu0 %v4037_v8  ;;  %v4839_v53 = vld [vmem:[%s4831_s22 + $0x40] sm:$0xff] }
 0x129   : > { %3830 = vmatpush3.bf16.msra.mxu0 %v4038_v12 }
 0x12a   : > { %1661 = vmatpush1.bf16.msra.mxu1 %v4006_v56  ;;  %3831 = vmatprep.subr.bf16.mxu0 %v4039_v24 }
 0x12b   : > { %1662 = vmatprep.subr.bf16.mxu1 %v4011_v58  ;;  %v4842_v58 = vld [vmem:[%s4831_s22 + $0x8] sm:$0xff] }
 0x12d   : > { %3832 = vmatpush3.bf16.msra.mxu0 %v4040_v25 }
 0x12e   : > { %1663 = vmatpush2.bf16.msra.mxu1 %v4009_v59  ;;  %3833 = vmatprep.subr.bf16.mxu0 %v4041_v26  ;;  %v4845_v59 = vld [vmem:[%s4831_s22 + $0x48] sm:$0xff] }
 0x12f   : > { %1664 = vmatprep.subr.bf16.mxu1 %v4014_v60  ;;  %v4848_v60 = vld [vmem:[%s4831_s22 + $0x10] sm:$0xff] }
 0x131   : > { %3834 = vmatpush3.bf16.msra.mxu0 %v4042_v27 }
 0x132   : > { %1665 = vmatpush2.bf16.msra.mxu1 %v4012_v61  ;;  %3835 = vmatprep.subr.bf16.mxu0 %v4043_v28 }
 0x133   : > { %1666 = vmatprep.subr.bf16.mxu1 %v4017_v62 }
 0x135   : > { %3836 = vmatpush3.bf16.msra.mxu0 %v4044_v29 }
 0x136   : > { %1667 = vmatpush2.bf16.msra.mxu1 %v4015_v63  ;;  %3837 = vmatprep.subr.bf16.mxu0 %v4045_v30  ;;  %v4851_v63 = vld [vmem:[%s4831_s22 + $0x50] sm:$0xff] }
 0x137   : > { %1668 = vmatprep.subr.bf16.mxu1 %v4020_v1  ;;  %v4854_v1 = vld [vmem:[%s4831_s22 + $0x18] sm:$0xff] }
 0x139   : > { %3838 = vmatpush3.bf16.msra.mxu0 %v4046_v31 }
 0x13a   : > { %1669 = vmatpush2.bf16.msra.mxu1 %v4018_v2  ;;  %3839 = vmatprep.subr.bf16.mxu0 %v4047_v32  ;;  %v4857_v2 = vld [vmem:[%s4831_s22 + $0x58] sm:$0xff] }
 0x13b   : > { %1670 = vmatprep.subr.bf16.mxu1 %v4023_v4 }
 0x13d   : > { %3840 = vmatpush3.bf16.msra.mxu0 %v4048_v33 }
 0x13e   : > { %1671 = vmatpush2.bf16.msra.mxu1 %v4021_v5 }
 0x13f   : > { %1672 = vmatprep.subr.bf16.mxu1 %v4026_v6 }
 0x142   : > { %1673 = vmatpush2.bf16.msra.mxu1 %v4024_v9 }
 0x143   : > { %1674 = vmatprep.subr.bf16.mxu1 %v4029_v10 }
 0x146   : > { %1675 = vmatpush2.bf16.msra.mxu1 %v4027_v11  ;;  %v4863_v11 = vld [vmem:[%s4831_s22 + $0x28] sm:$0xff] }
 0x147   : > { %1676 = vmatprep.subr.bf16.mxu1 %v4032_v13 }
 0x14a   : > { %1677 = vmatpush2.bf16.msra.mxu1 %v4030_v14 }
 0x14b   : > { %3797 = vmatprep.subr.bf16.mxu1 %v4033_v52 }
 0x14d   : > { %1679 = vmatmul.mubr.bf16.vlgmr.msra.gmra.mxu1 %v1048_v19 }
 0x14e   : > { %1688 = vmatprep.mubr.bf16.mxu1 %v1051_v20  ;;  %3798 = vmatpush3.bf16.msra.mxu1 %v4034_v7  ;;  %v4871_v20 = vld [vmem:[%s4831_s22 + $0x68] sm:$0xff] }
 0x14f   : > { %3799 = vmatprep.subr.bf16.mxu1 %v4035_v57 }
 0x152   : > { %3800 = vmatpush3.bf16.msra.mxu1 %v4036_v3 }
 0x153   : > { %3801 = vmatprep.subr.bf16.mxu1 %v4037_v8  ;;  %v4883_v8 = vld [vmem:[%s4831_s22 + $0x70] sm:$0xff] }
 0x155   : > { %1689 = vmatmul.mubr.bf16.gmra.mxu1 %v1050_v23 }
 0x156   : > { %3802 = vmatpush3.bf16.msra.mxu1 %v4038_v12 }
 0x157   : > { %3803 = vmatprep.subr.bf16.mxu1 %v4039_v24 }
 0x15a   : > { %3804 = vmatpush3.bf16.msra.mxu1 %v4040_v25 }
 0x15b   : > { %3805 = vmatprep.subr.bf16.mxu1 %v4041_v26 }
 0x15e   : > { %3806 = vmatpush3.bf16.msra.mxu1 %v4042_v27 }
 0x15f   : > { %3807 = vmatprep.subr.bf16.mxu1 %v4043_v28 }
 0x162   : > { %3808 = vmatpush3.bf16.msra.mxu1 %v4044_v29 }
 0x163   : > { %3809 = vmatprep.subr.bf16.mxu1 %v4045_v30 }
 0x166   : > { %3810 = vmatpush3.bf16.msra.mxu1 %v4046_v31 }
 0x167   : > { %3811 = vmatprep.subr.bf16.mxu1 %v4047_v32 }
 0x16a   : > { %3812 = vmatpush3.bf16.msra.mxu1 %v4048_v33 }
 0x1cd   : > { %v1254_v34 = vpop.f32.mrf.mxu1 }
 0x1cf   : > { %v1256_v35 = vpop.f32.mrf.mxu1 }
 0x1d1   : > { %v1258_v36 = vpop.f32.mrf.mxu1 }
 0x1d3   : > { %v1260_v38 = vpop.f32.mrf.mxu1 }
 0x1d5   : > { %v4817_v40 = vpop.f32.mrf.mxu1 }
 0x1d7   : > { %v4819_v42 = vpop.f32.mrf.mxu1 }
 0x1d9   : > { %v4821_v44 = vpop.f32.mrf.mxu1 }
 0x1db   : > { %v4825_v46 = vpop.f32.mrf.mxu1 }
 0x1de   : > { %v1467_v37 = vpop.f32.mrf.mxu0 }
 0x1df   : > { %v1699_v49 = vsub.f32 %v1254_v34, %v1467_v37 }
 0x1e0   : > { %v1469_v39 = vpop.f32.mrf.mxu0 }
 0x1e1   : > { %v1700_v54 = vsub.f32 %v1256_v35, %v1469_v39  ;;  %v1723_v10 = vmul.f32 %v1699_v49, %v4836_v51  ;;  %v1755_v16 = vmul.f32 %v4839_v53, %v1699_v49 }
 0x1e2   : > { %v1471_v41 = vpop.f32.mrf.mxu0 }
 0x1e3   : > { %v1701_v55 = vsub.f32 %v1258_v36, %v1471_v41  ;;  %v1724_v17 = vmul.f32 %v1700_v54, %v4842_v58  ;;  %v1756_v18 = vmul.f32 %v4845_v59, %v1700_v54 }
 0x1e4   : > { %v1473_v43 = vpop.f32.mrf.mxu0 }
 0x1e5   : > { %v1702_v61 = vsub.f32 %v1260_v38, %v1473_v43  ;;  %v1725_v19 = vmul.f32 %v1701_v55, %v4848_v60  ;;  %v1757_v23 = vmul.f32 %v4851_v63, %v1701_v55 }
 0x1e6   : > { %v4823_v45 = vpop.f32.mrf.mxu0 }
 0x1e7   : > { %v1726_v52 = vmul.f32 %v1702_v61, %v4854_v1  ;;  %v1758_v7 = vmul.f32 %v4857_v2, %v1702_v61  ;;  %v1703_v57 = vsub.f32 %v4817_v40, %v4823_v45 }
 0x1e8   : > { %v4833_v47 = vpop.f32.mrf.mxu0 }
 0x1e9   : > { %v1704_v4 = vsub.f32 %v4819_v42, %v4833_v47 }
 0x1ea   : > { %v1481_v5 = vpop.f32.mrf.mxu0 }
 0x1eb   : > { %v1705_v13 = vsub.f32 %v4821_v44, %v1481_v5  ;;  %v1728_v3 = vmul.f32 %v1704_v4, %v4863_v11  ;;  %v4887_v28 = vmul.f32 %v4871_v20, %v1704_v4 }
 0x1ec   : > { %v1483_v12 = vpop.f32.mrf.mxu0 }
 0x1ed   : > { %v1729_v29 = vmul.f32 %v1705_v13, %v4874_v21 }
 0x20d   : > { %v1680_v48 = vpop.f32.mrf.mxu1 }
 0x20e   : > { %v1707_v50 = vsub.f32 %v1680_v48, %v1254_v34 }
 0x20f   : > { %v1682_v56 = vpop.f32.mrf.mxu1 }
 0x210   : > { %v1708_v62 = vsub.f32 %v1682_v56, %v1256_v35  ;;  %v1715_v6 = vsub.f32 %v1707_v50, %v1467_v37  ;;  %v1761_v37 = vmul.f32 %v4883_v8, %v1705_v13  ;;  %v4908_v13 = vld [vmem:[%s4831_s22 + $0x78] sm:$0xff] }
 0x211   : > { %v1684_v9 = vpop.f32.mrf.mxu1 }
 0x212   : > { %v1716_v14 = vsub.f32 %v1708_v62, %v1469_v39  ;;  %v1709_v15 = vsub.f32 %v1684_v9, %v1258_v36  ;;  %v1731_v24 = vmul.f32 %v4839_v53, %v1715_v6  ;;  %v1747_v39 = vmul.f32 %v1715_v6, %v4836_v51 }
 0x213   : > { %v1686_v22 = vpop.f32.mrf.mxu1 }
 0x214   : > { %v1717_v25 = vsub.f32 %v1709_v15, %v1471_v41  ;;  %v1710_v26 = vsub.f32 %v1686_v22, %v1260_v38  ;;  %v1732_v30 = vmul.f32 %v4845_v59, %v1716_v14  ;;  %v1748_v31 = vmul.f32 %v1716_v14, %v4842_v58 }
 0x215   : > { %v1690_v27 = vpop.f32.mrf.mxu1  ;;  %v1706_v38 = vsub.f32 %v4825_v46, %v1483_v12  ;;  %v1739_v48 = vadd.f32 %v1731_v24, %v1723_v10  ;;  %v4905_v10 = vld [vmem:[%s4831_s22 + $0x38] sm:$0xff]  ;;  %v1763_v14 = vsub.f32 %v1747_v39, %v1755_v16 }
 0x216   : > { %v1733_v32 = vmul.f32 %v4851_v63, %v1717_v25  ;;  %v1749_v33 = vmul.f32 %v1717_v25, %v4848_v60  ;;  %v1718_v34 = vsub.f32 %v1710_v26, %v1473_v43  ;;  %v1711_v35 = vsub.f32 %v1690_v27, %v4817_v40 }
 0x217   : > { %v1692_v36 = vpop.f32.mrf.mxu1  ;;  %v1740_v61 = vadd.f32 %v1732_v30, %v1724_v17  ;;  %v1764_v6 = vsub.f32 %v1748_v31, %v1756_v18 }
 0x218   : > { %v1712_v41 = vsub.f32 %v1692_v36, %v4819_v42  ;;  %v1741_v49 = vadd.f32 %v1733_v32, %v1725_v19  ;;  %v1734_v50 = vmul.f32 %v4857_v2, %v1718_v34  ;;  %v1750_v54 = vmul.f32 %v1718_v34, %v4854_v1 }
 0x219   : > { %v1694_v43 = vpop.f32.mrf.mxu1  ;;  %v1765_v55 = vsub.f32 %v1749_v33, %v1757_v23  ;;  %v1719_v62 = vsub.f32 %v1711_v35, %v4823_v45  ;;  %v4914_v23 = vld [vmem:[%s4831_s22 + $0x20] sm:$0xff] }
 0x21a   : > { %v1720_v40 = vsub.f32 %v1712_v41, %v4833_v47  ;;  %v1713_v56 = vsub.f32 %v1694_v43, %v4821_v44  ;;  %v1742_v42 = vadd.f32 %v1734_v50, %v1726_v52  ;;  %v1766_v9 = vsub.f32 %v1750_v54, %v1758_v7  ;;  %v4917_v52 = vld [vmem:[%s4831_s22 + $0x60] sm:$0xff]  ;;  %v4055_v43 = vld [vmem:[%s5507_s8 + $0x10] ss:$8 sps:$4 sm:$0xff]   ;;  %s483_s22 = sld [smem:[#allocation3]] }
 0x21b   : > { %v1696_v4 = vpop.f32.mrf.mxu1  ;;  %v1771_v15 = vpack.c.bf16 %v1741_v49, %v1739_v48  ;;  %v1920_v18 = vpack.c.bf16 %v1765_v55, %v1763_v14  ;;  %v1735_v25 = vmul.f32 %v4917_v52, %v1719_v62  ;;  %v1751_v26 = vmul.f32 %v1719_v62, %v4914_v23  ;;  %v4060_v55 = vld [vmem:[%s5507_s8 + $0x4] ss:$8 sps:$4 sm:$0xff]  }
 0x21c   : > { %v1721_v19 = vsub.f32 %v1713_v56, %v1481_v5  ;;  %v1714_v47 = vsub.f32 %v1696_v4, %v4825_v46  ;;  %v1736_v44 = vmul.f32 %v4871_v20, %v1720_v40  ;;  %v1752_v17 = vmul.f32 %v1720_v40, %v4863_v11  ;;  %v4058_v40 = vld [vmem:[%s5507_s8] ss:$8 sps:$4 sm:$0xff]  }
 0x21d   : > { %v1772_v22 = vpack.c.bf16 %v1742_v42, %v1740_v61  ;;  %v1921_v45 = vpack.c.bf16 %v1766_v9, %v1764_v6  ;;  %v1730_v5 = vmul.f32 %v1706_v38, %v4905_v10  ;;  %v1762_v46 = vmul.f32 %v4908_v13, %v1706_v38 }
 0x21e   : > { %v1737_v7 = vmul.f32 %v4883_v8, %v1721_v19  ;;  %v1753_v24 = vmul.f32 %v1721_v19, %v4874_v21  ;;  %v1722_v16 = vsub.f32 %v1714_v47, %v1483_v12  ;;  %v1727_v31 = vmul.f32 %v1703_v57, %v4914_v23 }
 0x21f   : > { %1903 = vmatprep.mubr.bf16.mxu1 %v1772_v22  ;;  %1956 = vmatprep.mubr.bf16.mxu0 %v1921_v45  ;;  %v1759_v12 = vmul.f32 %v4917_v52, %v1703_v57  ;;  %v1744_v32 = vadd.f32 %v1736_v44, %v1728_v3  ;;  %v1768_v33 = vsub.f32 %v1752_v17, %v4887_v28  ;;  %v4051_v57 = vld [vmem:[%s5507_s8 + $0x34] ss:$8 sps:$4 sm:$0xff]   ;;  %v4049_v3 = vld [vmem:[%s5507_s8 + $0x30] ss:$8 sps:$4 sm:$0xff]   ;;  %v4054_v28 = vld [vmem:[%s5507_s8 + $0x24] ss:$8 sps:$4 sm:$0xff]   ;;  %v1991_v42 = vstv %s3368_s24 }
 0x220   : > { %v1738_v27 = vmul.f32 %v4908_v13, %v1722_v16  ;;  %v1754_v30 = vmul.f32 %v1722_v16, %v4905_v10  ;;  %1904 = vmatmul.mubr.bf16.vlgmr.msra.gmra.mxu1 %v1771_v15  ;;  %1957 = vmatmul.mubr.bf16.vlgmr.msra.gmra.mxu0 %v1920_v18  ;;  %v1745_v36 = vadd.f32 %v1737_v7, %v1729_v29  ;;  %v4052_v29 = vld [vmem:[%s5507_s8 + $0x20] ss:$8 sps:$4 sm:$0xff]   ;;  %v1973_v4 = vstv %s483_s22 }
 0x221   : > { %v1769_v38 = vsub.f32 %v1753_v24, %v1761_v37  ;;  %v1743_v48 = vadd.f32 %v1735_v25, %v1727_v31  ;;  %v1767_v49 = vsub.f32 %v1751_v26, %v1759_v12  ;;  %2078 = vmatprep.subr.bf16.mxu1 %v4051_v57  ;;  %2139 = vmatprep.subr.bf16.mxu0 %v4051_v57  ;;  %v4057_v37 = vld [vmem:[%s5507_s8 + $0x14] ss:$8 sps:$4 sm:$0xff]   ;;  %v1978_v9 = vstv %s3367_s25 }
 0x222   : > { %v1746_v34 = vadd.f32 %v1738_v27, %v1730_v5  ;;  %v1770_v35 = vsub.f32 %v1754_v30, %v1762_v46  ;;  %2079 = vmatpush1.bf16.msra.mxu1 %v4049_v3  ;;  %2140 = vmatpush1.bf16.msra.mxu0 %v4049_v3  ;;  %v1996_v14 = vstv %s3369_s11  ;;  %v2010_v12 = vstv %s2009_s28 }
 0x223   : > { %v1773_v50 = vpack.c.bf16 %v1745_v36, %v1743_v48  ;;  %v1922_v54 = vpack.c.bf16 %v1769_v38, %v1767_v49  ;;  %2080 = vmatprep.subr.bf16.mxu1 %v4054_v28  ;;  %2141 = vmatprep.subr.bf16.mxu0 %v4054_v28 }
 0x224   : > { %v1774_v39 = vpack.c.bf16 %v1746_v34, %v1744_v32  ;;  %v1923_v41 = vpack.c.bf16 %v1770_v35, %v1768_v33  ;;  %v2016_v32 = vstv %s2015_s29 }
 0x226   : > { %1911 = vmatprep.mubr.bf16.mxu1 %v1774_v39  ;;  %1964 = vmatprep.mubr.bf16.mxu0 %v1923_v41 }
 0x227   : > { %2081 = vmatpush1.bf16.msra.mxu1 %v4052_v29  ;;  %2142 = vmatpush1.bf16.msra.mxu0 %v4052_v29 }
 0x228   : > { %1912 = vmatmul.mubr.bf16.gmra.mxu1 %v1773_v50  ;;  %1965 = vmatmul.mubr.bf16.gmra.mxu0 %v1922_v54 }
 0x229   : > { %2102 = vmatprep.mubr.bf16.mxu1 %v4259_v0  ;;  %2163 = vmatprep.mubr.bf16.mxu0 %v4259_v0 }
 0x22a   : > { %2082 = vmatprep.subr.bf16.mxu1 %v4057_v37  ;;  %2143 = vmatprep.subr.bf16.mxu0 %v4057_v37 }
 0x22b   : > { %2083 = vmatpush1.bf16.msra.mxu1 %v4055_v43  ;;  %2144 = vmatpush1.bf16.msra.mxu0 %v4055_v43 }
 0x22c   : > { %2084 = vmatprep.subr.bf16.mxu1 %v4060_v55  ;;  %2145 = vmatprep.subr.bf16.mxu0 %v4060_v55 }
 0x22f   : > { %2085 = vmatpush1.bf16.msra.mxu1 %v4058_v40  ;;  %2146 = vmatpush1.bf16.msra.mxu0 %v4058_v40 }
 0x2e0   : > { %v3813_v56 = vpop.f32.mrf.mxu1  ;;  %v3841_v61 = vpop.f32.mrf.mxu0 }
 0x2e2   : > { %v3814_v62 = vpop.f32.mrf.mxu1  ;;  %v3842_v6 = vpop.f32.mrf.mxu0 }
 0x2e3   : > { %v3815_v15 = vadd.f32 %v3814_v62, %v3813_v56  ;;  %v3843_v19 = vadd.f32 %v3842_v6, %v3841_v61 }
 0x2e4   : > { %v3816_v47 = vpop.f32.mrf.mxu1  ;;  %v3844_v44 = vpop.f32.mrf.mxu0 }
 0x2e5   : > { %v1974_v17 = vmul.f32 %v3815_v15, %v1973_v4  ;;  %v1992_v22 = vmul.f32 %v3815_v15, %v1991_v42  ;;  %v1979_v45 = vmul.f32 %v3843_v19, %v1978_v9  ;;  %v1997_v18 = vmul.f32 %v3843_v19, %v1996_v14 }
 0x2e6   : > { %v3817_v7 = vpop.f32.mrf.mxu1  ;;  %v3845_v24 = vpop.f32.mrf.mxu0 }
 0x2e7   : > { %v3818_v16 = vadd.f32 %v3817_v7, %v3816_v47  ;;  %v3846_v5 = vadd.f32 %v3845_v24, %v3844_v44  ;;  %v1983_v26 = vadd.f32 %v1979_v45, %v1974_v17  ;;  %v2001_v27 = vadd.f32 %v1997_v18, %v1992_v22 }
 0x2e8   : > { %v3819_v46 = vpop.f32.mrf.mxu1  ;;  %v3847_v25 = vpop.f32.mrf.mxu0 }
 0x2e9   : > { %v1975_v30 = vmul.f32 %v3818_v16, %v1973_v4  ;;  %v1993_v31 = vmul.f32 %v3818_v16, %v1991_v42  ;;  %v1980_v33 = vmul.f32 %v3846_v5, %v1978_v9  ;;  %v1998_v34 = vmul.f32 %v3846_v5, %v1996_v14 }
 0x2ea   : > { %v3820_v35 = vpop.f32.mrf.mxu1  ;;  %v3848_v36 = vpop.f32.mrf.mxu0  ;;  %v2011_v54 = vadd.f32 %v2010_v12, %v1983_v26  ;;  %v2017_v57 = vadd.f32 %v2016_v32, %v2001_v27 }
 0x2eb   : > { %v3821_v38 = vadd.f32 %v3820_v35, %v3819_v46  ;;  %v3849_v39 = vadd.f32 %v3848_v36, %v3847_v25  ;;  %v1984_v41 = vadd.f32 %v1980_v33, %v1975_v30  ;;  %v2002_v48 = vadd.f32 %v1998_v34, %v1993_v31 }
 0x2ec   : > { %v3822_v49 = vpop.f32.mrf.mxu1  ;;  %v3850_v50 = vpop.f32.mrf.mxu0 }
 0x2ed   : > { %v1976_v3 = vmul.f32 %v3821_v38, %v1973_v4  ;;  %v1981_v28 = vmul.f32 %v3849_v39, %v1978_v9  ;;  %v2012_v29 = vadd.f32 %v2010_v12, %v1984_v41  ;;  %v2018_v37 = vadd.f32 %v2016_v32, %v2002_v48 }
 0x2ee   : > { %v1994_v43 = vmul.f32 %v3821_v38, %v1991_v42  ;;  %v1999_v55 = vmul.f32 %v3849_v39, %v1996_v14  ;;  %v3823_v40 = vpop.f32.mrf.mxu1  ;;  %v3851_v56 = vpop.f32.mrf.mxu0 }
 0x2ef   : > { %v3824_v61 = vadd.f32 %v3823_v40, %v3822_v49  ;;  %v3852_v62 = vadd.f32 %v3851_v56, %v3850_v50  ;;  %v2021_v6 = vpack.c.bf16 %v2012_v29, %v2011_v54  ;;  %v2123_v15 = vpack.c.bf16 %v2018_v37, %v2017_v57 }
 0x2f0   : > { %v1985_v19 = vadd.f32 %v1981_v28, %v1976_v3  ;;  %v2003_v17 = vadd.f32 %v1999_v55, %v1994_v43 }
 0x2f1   : > { %v1977_v47 = vmul.f32 %v3824_v61, %v1973_v4  ;;  %v1995_v44 = vmul.f32 %v3824_v61, %v1991_v42  ;;  %v1982_v22 = vmul.f32 %v3852_v62, %v1978_v9  ;;  %v2000_v45 = vmul.f32 %v3852_v62, %v1996_v14  ;;  %3663 = vmatmul.mubr.msk.bf16.vlgmr.msra.gmra.mxu1 %vm2063_vm1, %v2021_v6 }
 0x2f2   : > { %3665 = vmatmul.mubr.msk.bf16.vlgmr.msra.gmra.mxu0 %vm2063_vm1, %v2123_v15  ;;  %2112 = vmatprep.mubr.bf16.mxu1 %v4259_v0  ;;  %v2013_v24 = vadd.f32 %v2010_v12, %v1985_v19  ;;  %v2019_v16 = vadd.f32 %v2016_v32, %v2003_v17 }
 0x2f3   : > { %2173 = vmatprep.mubr.bf16.mxu0 %v4259_v0  ;;  %v1986_v18 = vadd.f32 %v1982_v22, %v1977_v47  ;;  %v2004_v7 = vadd.f32 %v2000_v45, %v1995_v44 }
 0x2f5   : > { %v2014_v5 = vadd.f32 %v2010_v12, %v1986_v18  ;;  %v2020_v46 = vadd.f32 %v2016_v32, %v2004_v7 }
 0x2f7   : > { %v2022_v25 = vpack.c.bf16 %v2014_v5, %v2013_v24  ;;  %v2124_v4 = vpack.c.bf16 %v2020_v46, %v2019_v16 }
 0x2f9   : > { %3664 = vmatmul.mubr.msk.bf16.gmra.mxu1 %vm2063_vm1, %v2022_v25 }
 0x2fa   : > { %3666 = vmatmul.mubr.msk.bf16.gmra.mxu0 %vm2063_vm1, %v2124_v4  ;;  %2300 = vmatprep.mubr.bf16.mxu1 %v4259_v0 }
 0x2fb   : > { %2369 = vmatprep.mubr.bf16.mxu0 %v4259_v0 }
 0x3b1   : > { %v2104_v42 = vpop.f32.mrf.mxu1 }
 0x3b2   : > { %v2165_v9 = vpop.f32.mrf.mxu0  ;;  %v2184_v34 = vmul.f32 %v2104_v42, %v4836_v51  ;;  %v2208_v35 = vmul.f32 %v4839_v53, %v2104_v42 }
 0x3b3   : > { %v2106_v14 = vpop.f32.mrf.mxu1  ;;  %v2192_v36 = vmul.f32 %v4839_v53, %v2165_v9  ;;  %v2216_v25 = vmul.f32 %v2165_v9, %v4836_v51 }
 0x3b4   : > { %v2167_v26 = vpop.f32.mrf.mxu0  ;;  %v2185_v38 = vmul.f32 %v2106_v14, %v4842_v58  ;;  %v2209_v39 = vmul.f32 %v4845_v59, %v2106_v14 }
 0x3b5   : > { %v2108_v27 = vpop.f32.mrf.mxu1  ;;  %v2193_v41 = vmul.f32 %v4845_v59, %v2167_v26  ;;  %v2217_v48 = vmul.f32 %v2167_v26, %v4842_v58 }
 0x3b6   : > { %v2169_v30 = vpop.f32.mrf.mxu0  ;;  %v2186_v49 = vmul.f32 %v2108_v27, %v4848_v60  ;;  %v2210_v57 = vmul.f32 %v4851_v63, %v2108_v27 }
 0x3b7   : > { %v2110_v31 = vpop.f32.mrf.mxu1  ;;  %v2194_v45 = vmul.f32 %v4851_v63, %v2169_v30  ;;  %v2201_v4 = vsub.f32 %v2185_v38, %v2193_v41  ;;  %v2225_v14 = vadd.f32 %v2217_v48, %v2209_v39  ;;  %v4069_v38 = vld [vmem:[%s5505_s6 + $0x74] ss:$8 sps:$4 sm:$0xff]  }
 0x3b8   : > { %v2171_v33 = vpop.f32.mrf.mxu0  ;;  %v2187_v3 = vmul.f32 %v2110_v31, %v4854_v1  ;;  %v2211_v28 = vmul.f32 %v4857_v2, %v2110_v31 }
 0x3b9   : > { %v2114_v12 = vpop.f32.mrf.mxu1  ;;  %v2195_v53 = vmul.f32 %v4857_v2, %v2171_v33  ;;  %v2219_v29 = vmul.f32 %v2171_v33, %v4854_v1  ;;  %v2202_v63 = vsub.f32 %v2186_v49, %v2194_v45  ;;  %v2200_v33 = vsub.f32 %v2184_v34, %v2192_v36  ;;  %v4061_v34 = vld [vmem:[%s5504_s5] sm:$0xff]   ;;  %v4094_v45 = vld [vmem:[%s5505_s6 + $0x150] ss:$8 sps:$4 sm:$0xff]  }
 0x3ba   : > { %v2175_v32 = vpop.f32.mrf.mxu0  ;;  %v2188_v37 = vmul.f32 %v2114_v12, %v4914_v23  ;;  %v2212_v59 = vmul.f32 %v4917_v52, %v2114_v12  ;;  %v2233_v49 = vadd.f32 %v2225_v14, %v2201_v4 }
 0x3bb   : > { %v2116_v50 = vpop.f32.mrf.mxu1  ;;  %v2196_v58 = vmul.f32 %v4917_v52, %v2175_v32  ;;  %v2220_v47 = vmul.f32 %v2175_v32, %v4914_v23  ;;  %v2227_v16 = vadd.f32 %v2219_v29, %v2211_v28  ;;  %v2224_v32 = vadd.f32 %v2216_v25, %v2208_v35  ;;  %v4062_v35 = vld [vmem:[%s5504_s5 + $0x10] sm:$0xff]   ;;  %v4112_v25 = vld [vmem:[%s5505_s6 + $0x120] ss:$8 sps:$4 sm:$0xff]  }
 0x3bc   : > { %v2177_v54 = vpop.f32.mrf.mxu0  ;;  %v2189_v40 = vmul.f32 %v2116_v50, %v4863_v11  ;;  %v2213_v2 = vmul.f32 %v4871_v20, %v2116_v50  ;;  %v2244_v51 = vpack.c.bf16 %v2202_v63, %v2200_v33 }
 0x3bd   : > { %v2118_v43 = vpop.f32.mrf.mxu1  ;;  %v2197_v56 = vmul.f32 %v4871_v20, %v2177_v54  ;;  %v2221_v1 = vmul.f32 %v2177_v54, %v4863_v11  ;;  %v2218_v20 = vmul.f32 %v2169_v30, %v4848_v60  ;;  %v2204_v5 = vsub.f32 %v2188_v37, %v2196_v58  ;;  %v4084_v37 = vld [vmem:[%s5505_s6 + $0x174] ss:$8 sps:$4 sm:$0xff]   ;;  %v4070_v58 = vld [vmem:[%s5505_s6 + $0x60] ss:$8 sps:$4 sm:$0xff]  }
 0x3be   : > { %v2179_v55 = vpop.f32.mrf.mxu0  ;;  %v2190_v61 = vmul.f32 %v2118_v43, %v4874_v21  ;;  %v2214_v62 = vmul.f32 %v4883_v8, %v2118_v43  ;;  %v2228_v42 = vadd.f32 %v2220_v47, %v2212_v59  ;;  %v2249_v12 = vpack.c.bf16 %v2227_v16, %v2225_v14  ;;  %v4063_v43 = vld [vmem:[%s5504_s5 + $0x8] sm:$0xff]   ;;  %v4118_v14 = vld [vmem:[%s5505_s6 + $0x110] ss:$8 sps:$4 sm:$0xff]  }
 0x3bf   : > { %v2198_v6 = vmul.f32 %v4883_v8, %v2179_v55  ;;  %v2222_v15 = vmul.f32 %v2179_v55, %v4874_v21  ;;  %v2120_v19 = vpop.f32.mrf.mxu1  ;;  %v2203_v8 = vsub.f32 %v2187_v3, %v2195_v53  ;;  %v2205_v7 = vsub.f32 %v2189_v40, %v2197_v56  ;;  %v4067_v3 = vld [vmem:[%s5505_s6 + $0x70] ss:$8 sps:$4 sm:$0xff]   ;;  %v4072_v53 = vld [vmem:[%s5505_s6 + $0x64] ss:$8 sps:$4 sm:$0xff]   ;;  %v4075_v55 = vld [vmem:[%s5505_s6 + $0x54] ss:$8 sps:$4 sm:$0xff]  }
 0x3c0   : > { %v2181_v52 = vpop.f32.mrf.mxu0  ;;  %v2191_v44 = vmul.f32 %v2120_v19, %v4905_v10  ;;  %v2215_v17 = vmul.f32 %v4908_v13, %v2120_v19  ;;  %v2229_v23 = vadd.f32 %v2221_v1, %v2213_v2  ;;  %v2226_v27 = vadd.f32 %v2218_v20, %v2210_v57  ;;  %v4065_v40 = vld [vmem:[%s5504_s5 + $0x18] sm:$0xff]   ;;  %v4064_v2 = vld [vmem:[%s5504_s5 + $0x20] sm:$0xff]  }
 0x3c1   : > { %v2199_v22 = vmul.f32 %v4908_v13, %v2181_v52  ;;  %v2206_v18 = vsub.f32 %v2190_v61, %v2198_v6  ;;  %v2223_v11 = vmul.f32 %v2181_v52, %v4905_v10  ;;  %v2230_v21 = vadd.f32 %v2222_v15, %v2214_v62  ;;  %v4073_v56 = vld [vmem:[%s5505_s6 + $0x50] ss:$8 sps:$4 sm:$0xff]   ;;  %v4078_v61 = vld [vmem:[%s5505_s6 + $0x44] ss:$8 sps:$4 sm:$0xff]   ;;  %v4076_v62 = vld [vmem:[%s5505_s6 + $0x40] ss:$8 sps:$4 sm:$0xff]  }
 0x3c2   : > { %v2245_v31 = vpack.c.bf16 %v2203_v8, %v2201_v4  ;;  %v2237_v50 = vadd.f32 %v2229_v23, %v2205_v7  ;;  %v2248_v39 = vpack.c.bf16 %v2226_v27, %v2224_v32  ;;  %v2235_v41 = vadd.f32 %v2227_v16, %v2203_v8  ;;  %v4081_v1 = vld [vmem:[%s5505_s6 + $0x34] ss:$8 sps:$4 sm:$0xff]   ;;  %v4082_v6 = vld [vmem:[%s5505_s6 + $0x170] ss:$8 sps:$4 sm:$0xff]   ;;  %v4090_v15 = vld [vmem:[%s5505_s6 + $0x164] ss:$8 sps:$4 sm:$0xff]  }
 0x3c3   : > { %v2207_v24 = vsub.f32 %v2191_v44, %v2199_v22  ;;  %v2231_v46 = vadd.f32 %v2223_v11, %v2215_v17  ;;  %v2246_v26 = vpack.c.bf16 %v2206_v18, %v2204_v5  ;;  %v2250_v30 = vpack.c.bf16 %v2230_v21, %v2228_v42  ;;  %v4079_v19 = vld [vmem:[%s5505_s6 + $0x30] ss:$8 sps:$4 sm:$0xff]   ;;  %v4087_v52 = vld [vmem:[%s5505_s6 + $0x24] ss:$8 sps:$4 sm:$0xff]   ;;  %v4088_v47 = vld [vmem:[%s5505_s6 + $0x160] ss:$8 sps:$4 sm:$0xff]  }
 0x3c4   : > { %v2238_v9 = vadd.f32 %v2230_v21, %v2206_v18  ;;  %v2236_v36 = vadd.f32 %v2228_v42, %v2204_v5  ;;  %v2234_v54 = vadd.f32 %v2226_v27, %v2202_v63  ;;  %v2241_v28 = vpack.c.bf16 %v2235_v41, %v2233_v49  ;;  %v4096_v44 = vld [vmem:[%s5505_s6 + $0x154] ss:$8 sps:$4 sm:$0xff]   ;;  %v4085_v17 = vld [vmem:[%s5505_s6 + $0x20] ss:$8 sps:$4 sm:$0xff]   ;;  %v4102_v20 = vld [vmem:[%s5505_s6 + $0x144] ss:$8 sps:$4 sm:$0xff]  }
 0x3c5   : > { %v2247_v13 = vpack.c.bf16 %v2207_v24, %v2205_v7  ;;  %v2251_v60 = vpack.c.bf16 %v2231_v46, %v2229_v23  ;;  %v2239_v10 = vadd.f32 %v2231_v46, %v2207_v24  ;;  %v2232_v29 = vadd.f32 %v2224_v32, %v2200_v33  ;;  %v4066_v22 = vld [vmem:[%s5504_s5 + $0x28] sm:$0xff]   ;;  %v4091_v18 = vld [vmem:[%s5505_s6 + $0x10] ss:$8 sps:$4 sm:$0xff]   ;;  %v4108_v7 = vld [vmem:[%s5505_s6 + $0x134] ss:$8 sps:$4 sm:$0xff]  }
 0x3c6   : > { %v2242_v57 = vpack.c.bf16 %v2238_v9, %v2236_v36  ;;  %v4099_v11 = vld [vmem:[%s5505_s6 + $0x4] ss:$8 sps:$4 sm:$0xff]   ;;  %v4100_v8 = vld [vmem:[%s5505_s6 + $0x140] ss:$8 sps:$4 sm:$0xff]   ;;  %v4105_v24 = vld [vmem:[%s5505_s6 + $0xf4] ss:$8 sps:$4 sm:$0xff]  }
 0x3c7   : > { %2280 = vmatprep.subr.bf16.mxu1 %v2247_v13  ;;  %2349 = vmatprep.subr.bf16.mxu0 %v2251_v60  ;;  %v2243_v48 = vpack.c.bf16 %v2239_v10, %v2237_v50  ;;  %v2240_v59 = vpack.c.bf16 %v2234_v54, %v2232_v29  ;;  %v4097_v21 = vld [vmem:[%s5505_s6] ss:$8 sps:$4 sm:$0xff]   ;;  %v4106_v16 = vld [vmem:[%s5505_s6 + $0x130] ss:$8 sps:$4 sm:$0xff]   ;;  %v4114_v5 = vld [vmem:[%s5505_s6 + $0x124] ss:$8 sps:$4 sm:$0xff]  }
 0x3c8   : > { %2281 = vmatpush1.bf16.msra.mxu1 %v2246_v26  ;;  %2350 = vmatpush1.bf16.msra.mxu0 %v2250_v30  ;;  %v4103_v23 = vld [vmem:[%s5505_s6 + $0xf0] ss:$8 sps:$4 sm:$0xff]   ;;  %v4111_v46 = vld [vmem:[%s5505_s6 + $0xe4] ss:$8 sps:$4 sm:$0xff]   ;;  %v4120_v4 = vld [vmem:[%s5505_s6 + $0x114] ss:$8 sps:$4 sm:$0xff]  }
 0x3c9   : > { %2282 = vmatprep.subr.bf16.mxu1 %v2245_v31  ;;  %2351 = vmatprep.subr.bf16.mxu0 %v2249_v12  ;;  %v4109_v42 = vld [vmem:[%s5505_s6 + $0xe0] ss:$8 sps:$4 sm:$0xff]   ;;  %v4117_v13 = vld [vmem:[%s5505_s6 + $0xd4] ss:$8 sps:$4 sm:$0xff]   ;;  %v4126_v63 = vld [vmem:[%s5505_s6 + $0x104] ss:$8 sps:$4 sm:$0xff]  }
 0x3ca   : > { %v4115_v26 = vld [vmem:[%s5505_s6 + $0xd0] ss:$8 sps:$4 sm:$0xff]   ;;  %v4123_v60 = vld [vmem:[%s5505_s6 + $0xc4] ss:$8 sps:$4 sm:$0xff]   ;;  %v4124_v27 = vld [vmem:[%s5505_s6 + $0x100] ss:$8 sps:$4 sm:$0xff]  }
 0x3cb   : > { %v4132_v30 = vld [vmem:[%s5505_s6 + $0x1f4] ss:$8 sps:$4 sm:$0xff]   ;;  %v4121_v10 = vld [vmem:[%s5505_s6 + $0xc0] ss:$8 sps:$4 sm:$0xff]   ;;  %v4130_v33 = vld [vmem:[%s5505_s6 + $0x1f0] ss:$8 sps:$4 sm:$0xff]  }
 0x3cc   : > { %2283 = vmatpush1.bf16.msra.mxu1 %v2244_v51  ;;  %2352 = vmatpush1.bf16.msra.mxu0 %v2248_v39  ;;  %v4129_v31 = vld [vmem:[%s5505_s6 + $0xb4] ss:$8 sps:$4 sm:$0xff]   ;;  %v4127_v12 = vld [vmem:[%s5505_s6 + $0xb0] ss:$8 sps:$4 sm:$0xff]   ;;  %v4135_v32 = vld [vmem:[%s5505_s6 + $0xa4] ss:$8 sps:$4 sm:$0xff]  }
 0x3cd   : > { %2418 = vmatprep.subr.bf16.mxu1 %v2243_v48  ;;  %2663 = vmatprep.subr.bf16.mxu0 %v4069_v38  ;;  %v4133_v50 = vld [vmem:[%s5505_s6 + $0xa0] ss:$8 sps:$4 sm:$0xff]   ;;  %v4138_v9 = vld [vmem:[%s5505_s6 + $0x1e4] ss:$8 sps:$4 sm:$0xff]   ;;  %v4139_v38 = vld [vmem:[%s5505_s6 + $0x90] ss:$8 sps:$4 sm:$0xff]  }
 0x3ce   : > { %v4136_v51 = vld [vmem:[%s5505_s6 + $0x1e0] ss:$8 sps:$4 sm:$0xff]   ;;  %v4141_v39 = vld [vmem:[%s5505_s6 + $0x94] ss:$8 sps:$4 sm:$0xff]   ;;  %v4142_v41 = vld [vmem:[%s5505_s6 + $0x1d0] ss:$8 sps:$4 sm:$0xff]  }
 0x3cf   : > { %3669 = vmatmul.mubr.msk.bf16.vlgmr.msra.gmra.mxu1 %vm720_vm0, %v4061_v34  ;;  %3673 = vmatmul.mubr.msk.bf16.vlgmr.msra.gmra.mxu0 %vm720_vm0, %v4062_v35  ;;  %v4144_v48 = vld [vmem:[%s5505_s6 + $0x1d4] ss:$8 sps:$4 sm:$0xff]   ;;  %v4145_v34 = vld [vmem:[%s5505_s6 + $0x80] ss:$8 sps:$4 sm:$0xff]   ;;  %v4147_v36 = vld [vmem:[%s5505_s6 + $0x84] ss:$8 sps:$4 sm:$0xff]  }
 0x3d0   : > { %2419 = vmatpush1.bf16.msra.mxu1 %v2242_v57  ;;  %2310 = vmatprep.mubr.bf16.mxu1 %v4259_v0  ;;  %v4150_v35 = vld [vmem:[%s5505_s6 + $0x1c4] ss:$8 sps:$4 sm:$0xff]   ;;  %v4153_v49 = vld [vmem:[%s5505_s6 + $0x274] ss:$8 sps:$4 sm:$0xff]   ;;  %v4148_v54 = vld [vmem:[%s5505_s6 + $0x1c0] ss:$8 sps:$4 sm:$0xff]  }
 0x3d1   : > { %2420 = vmatprep.subr.bf16.mxu1 %v2241_v28  ;;  %2379 = vmatprep.mubr.bf16.mxu0 %v4259_v0  ;;  %v4156_v57 = vld [vmem:[%s5505_s6 + $0x1b4] ss:$8 sps:$4 sm:$0xff]   ;;  %v4162_v28 = vld [vmem:[%s5505_s6 + $0x1a4] ss:$8 sps:$4 sm:$0xff]  }
 0x3d2   : > { %2664 = vmatpush1.bf16.msra.mxu0 %v4067_v3  ;;  %v4154_v3 = vld [vmem:[%s5505_s6 + $0x1b0] ss:$8 sps:$4 sm:$0xff]   ;;  %v4168_v29 = vld [vmem:[%s5505_s6 + $0x194] ss:$8 sps:$4 sm:$0xff]  }
 0x3d3   : > { %2665 = vmatprep.subr.bf16.mxu0 %v4072_v53  ;;  %v4160_v53 = vld [vmem:[%s5505_s6 + $0x1a0] ss:$8 sps:$4 sm:$0xff]  }
 0x3d4   : > { %2421 = vmatpush1.bf16.msra.mxu1 %v2240_v59  ;;  %v4174_v59 = vld [vmem:[%s5505_s6 + $0x184] ss:$8 sps:$4 sm:$0xff]  }
 0x3d5   : > { %2876 = vmatprep.subr.bf16.mxu1 %v4084_v37  ;;  %v4166_v37 = vld [vmem:[%s5505_s6 + $0x190] ss:$8 sps:$4 sm:$0xff]  }
 0x3d6   : > { %2666 = vmatpush1.bf16.msra.mxu0 %v4070_v58  ;;  %v4172_v58 = vld [vmem:[%s5505_s6 + $0x180] ss:$8 sps:$4 sm:$0xff]  }
 0x3d7   : > { %3670 = vmatmul.mubr.msk.bf16.gmra.mxu1 %vm720_vm0, %v4063_v43  ;;  %2667 = vmatprep.subr.bf16.mxu0 %v4075_v55 }
 0x3d8   : > { %2438 = vmatprep.mubr.bf16.mxu1 %v4259_v0  ;;  %3674 = vmatmul.mubr.msk.bf16.gmra.mxu0 %vm720_vm0, %v4065_v40 }
 0x3da   : > { %2668 = vmatpush1.bf16.msra.mxu0 %v4073_v56 }
 0x3db   : > { %2669 = vmatprep.subr.bf16.mxu0 %v4078_v61 }
 0x3de   : > { %2670 = vmatpush1.bf16.msra.mxu0 %v4076_v62 }
 0x3df   : > { %3677 = vmatmul.mubr.msk.bf16.vlgmr.msra.gmra.mxu1 %vm720_vm0, %v4064_v2  ;;  %2671 = vmatprep.subr.bf16.mxu0 %v4081_v1 }
 0x3e0   : > { %2448 = vmatprep.mubr.bf16.mxu1 %v4259_v0  ;;  %2877 = vmatpush1.bf16.msra.mxu1 %v4082_v6  ;;  %v4093_v0 = vld [vmem:[%s5505_s6 + $0x14] ss:$8 sps:$4 sm:$0xff]  }
 0x3e1   : > { %2878 = vmatprep.subr.bf16.mxu1 %v4090_v15 }
 0x3e2   : > { %2672 = vmatpush1.bf16.msra.mxu0 %v4079_v19 }
 0x3e3   : > { %2673 = vmatprep.subr.bf16.mxu0 %v4087_v52 }
 0x3e4   : > { %2879 = vmatpush1.bf16.msra.mxu1 %v4088_v47 }
 0x3e5   : > { %2880 = vmatprep.subr.bf16.mxu1 %v4096_v44 }
 0x3e6   : > { %2674 = vmatpush1.bf16.msra.mxu0 %v4085_v17 }
 0x3e7   : > { %3678 = vmatmul.mubr.msk.bf16.gmra.mxu1 %vm720_vm0, %v4066_v22  ;;  %2675 = vmatprep.subr.bf16.mxu0 %v4093_v0  ;;  %v4151_v0 = vld [vmem:[%s5505_s6 + $0x270] ss:$8 sps:$4 sm:$0xff]  }
 0x3e8   : > { %2881 = vmatpush1.bf16.msra.mxu1 %v4094_v45 }
 0x3e9   : > { %2882 = vmatprep.subr.bf16.mxu1 %v4102_v20  ;;  %v4159_v20 = vld [vmem:[%s5505_s6 + $0x264] ss:$8 sps:$4 sm:$0xff]  }
 0x3ea   : > { %2676 = vmatpush1.bf16.msra.mxu0 %v4091_v18 }
 0x3eb   : > { %2677 = vmatprep.subr.bf16.mxu0 %v4099_v11 }
 0x3ec   : > { %2883 = vmatpush1.bf16.msra.mxu1 %v4100_v8 }
 0x3ed   : > { %2884 = vmatprep.subr.bf16.mxu1 %v4108_v7 }
 0x3ee   : > { %2678 = vmatpush1.bf16.msra.mxu0 %v4097_v21 }
 0x3ef   : > { %2679 = vmatprep.subr.bf16.mxu0 %v4105_v24  ;;  %v4157_v24 = vld [vmem:[%s5505_s6 + $0x260] ss:$8 sps:$4 sm:$0xff]  }
 0x3f0   : > { %2885 = vmatpush1.bf16.msra.mxu1 %v4106_v16 }
 0x3f1   : > { %2886 = vmatprep.subr.bf16.mxu1 %v4114_v5 }
 0x3f2   : > { %2680 = vmatpush2.bf16.msra.mxu0 %v4103_v23  ;;  %v4165_v23 = vld [vmem:[%s5505_s6 + $0x254] ss:$8 sps:$4 sm:$0xff]  }
 0x3f3   : > { %2681 = vmatprep.subr.bf16.mxu0 %v4111_v46 }
 0x3f4   : > { %2887 = vmatpush1.bf16.msra.mxu1 %v4112_v25 }
 0x3f5   : > { %2888 = vmatprep.subr.bf16.mxu1 %v4120_v4 }
 0x3f6   : > { %2682 = vmatpush2.bf16.msra.mxu0 %v4109_v42 }
 0x3f7   : > { %2683 = vmatprep.subr.bf16.mxu0 %v4117_v13 }
 0x3f8   : > { %2889 = vmatpush1.bf16.msra.mxu1 %v4118_v14  ;;  %v4163_v14 = vld [vmem:[%s5505_s6 + $0x250] ss:$8 sps:$4 sm:$0xff]  }
 0x3f9   : > { %2890 = vmatprep.subr.bf16.mxu1 %v4126_v63 }
 0x3fa   : > { %2684 = vmatpush2.bf16.msra.mxu0 %v4115_v26 }
 0x3fb   : > { %2685 = vmatprep.subr.bf16.mxu0 %v4123_v60  ;;  %v4171_v60 = vld [vmem:[%s5505_s6 + $0x244] ss:$8 sps:$4 sm:$0xff]  }
 0x3fc   : > { %2891 = vmatpush1.bf16.msra.mxu1 %v4124_v27 }
 0x3fd   : > { %2892 = vmatprep.subr.bf16.mxu1 %v4132_v30 }
 0x3fe   : > { %2686 = vmatpush2.bf16.msra.mxu0 %v4121_v10 }
 0x3ff   : > { %2687 = vmatprep.subr.bf16.mxu0 %v4129_v31 }
 0x400   : > { %2893 = vmatpush2.bf16.msra.mxu1 %v4130_v33  ;;  %v4169_v33 = vld [vmem:[%s5505_s6 + $0x240] ss:$8 sps:$4 sm:$0xff]  }
 0x401   : > { %2894 = vmatprep.subr.bf16.mxu1 %v4138_v9 }
 0x402   : > { %2688 = vmatpush2.bf16.msra.mxu0 %v4127_v12 }
 0x403   : > { %2689 = vmatprep.subr.bf16.mxu0 %v4135_v32 }
 0x404   : > { %2895 = vmatpush2.bf16.msra.mxu1 %v4136_v51 }
 0x405   : > { %2896 = vmatprep.subr.bf16.mxu1 %v4144_v48 }
 0x406   : > { %2690 = vmatpush2.bf16.msra.mxu0 %v4133_v50  ;;  %v4177_v50 = vld [vmem:[%s5505_s6 + $0x234] ss:$8 sps:$4 sm:$0xff]  }
 0x407   : > { %2691 = vmatprep.subr.bf16.mxu0 %v4141_v39 }
 0x408   : > { %2897 = vmatpush2.bf16.msra.mxu1 %v4142_v41  ;;  %v4175_v41 = vld [vmem:[%s5505_s6 + $0x230] ss:$8 sps:$4 sm:$0xff]  }
 0x409   : > { %2898 = vmatprep.subr.bf16.mxu1 %v4150_v35 }
 0x40a   : > { %2692 = vmatpush2.bf16.msra.mxu0 %v4139_v38 }
 0x40b   : > { %2693 = vmatprep.subr.bf16.mxu0 %v4147_v36 }
 0x40c   : > { %2899 = vmatpush2.bf16.msra.mxu1 %v4148_v54  ;;  %v4180_v54 = vld [vmem:[%s5505_s6 + $0x224] ss:$8 sps:$4 sm:$0xff]  }
 0x40d   : > { %2900 = vmatprep.subr.bf16.mxu1 %v4156_v57 }
 0x40e   : > { %2694 = vmatpush2.bf16.msra.mxu0 %v4145_v34 }
 0x40f   : > { %3089 = vmatprep.subr.bf16.mxu0 %v4153_v49 }
 0x410   : > { %2901 = vmatpush2.bf16.msra.mxu1 %v4154_v3 }
 0x411   : > { %2902 = vmatprep.subr.bf16.mxu1 %v4162_v28 }
 0x414   : > { %2903 = vmatpush2.bf16.msra.mxu1 %v4160_v53 }
 0x415   : > { %2904 = vmatprep.subr.bf16.mxu1 %v4168_v29 }
 0x418   : > { %2905 = vmatpush2.bf16.msra.mxu1 %v4166_v37  ;;  %v4178_v37 = vld [vmem:[%s5505_s6 + $0x220] ss:$8 sps:$4 sm:$0xff]  }
 0x419   : > { %2906 = vmatprep.subr.bf16.mxu1 %v4174_v59 }
 0x41c   : > { %2907 = vmatpush2.bf16.msra.mxu1 %v4172_v58 }
 0x48f   : > { %v2302_v43 = vpop.f32.mrf.mxu1  ;;  %v2371_v55 = vpop.f32.mrf.mxu0 }
 0x490   : > { %v5229_v47 = vsub.f32 %v2302_v43, %v2371_v55 }
 0x491   : > { %v2304_v40 = vpop.f32.mrf.mxu1  ;;  %v2373_v56 = vpop.f32.mrf.mxu0 }
 0x492   : > { %v2460_v15 = vsub.f32 %v2304_v40, %v2373_v56 }
 0x493   : > { %v2306_v61 = vpop.f32.mrf.mxu1  ;;  %v2375_v62 = vpop.f32.mrf.mxu0 }
 0x494   : > { %v5225_v1 = vsub.f32 %v2306_v61, %v2375_v62 }
 0x495   : > { %v2308_v2 = vpop.f32.mrf.mxu1  ;;  %v2377_v6 = vpop.f32.mrf.mxu0 }
 0x496   : > { %v2462_v19 = vsub.f32 %v2308_v2, %v2377_v6  ;;  %v2495_v45 = vpack.c.bf16 %v5225_v1, %v5229_v47 }
 0x497   : > { %v5227_v52 = vpop.f32.mrf.mxu1 }
 0x498   : > { %v5231_v44 = vpop.f32.mrf.mxu0  ;;  %v2496_v17 = vpack.c.bf16 %v2462_v19, %v2460_v15 }
 0x499   : > { %v5233_v22 = vpop.f32.mrf.mxu1  ;;  %v5249_v8 = vsub.f32 %v5227_v52, %v5231_v44 }
 0x49a   : > { %v5243_v18 = vpop.f32.mrf.mxu0  ;;  %2695 = vmatprep.mubr.bf16.mxu0 %v2496_v17  ;;  %v4192_v17 = vld [vmem:[%s5505_s6 + $0x2e4] ss:$8 sps:$4 sm:$0xff]  }
 0x49b   : > { %v5245_v11 = vpop.f32.mrf.mxu1  ;;  %2696 = vmatmul.mubr.bf16.vlgmr.msra.gmra.mxu0 %v2495_v45  ;;  %v5256_v16 = vsub.f32 %v5233_v22, %v5243_v18  ;;  %v4193_v45 = vld [vmem:[%s5505_s6 + $0x2d0] ss:$8 sps:$4 sm:$0xff]  }
 0x49c   : > { %v2385_v7 = vpop.f32.mrf.mxu0  ;;  %3090 = vmatpush1.bf16.msra.mxu0 %v4151_v0  ;;  %v4195_v0 = vld [vmem:[%s5505_s6 + $0x2d4] ss:$8 sps:$4 sm:$0xff]  }
 0x49d   : > { %v2318_v21 = vpop.f32.mrf.mxu1  ;;  %v5259_v5 = vsub.f32 %v5245_v11, %v2385_v7  ;;  %3091 = vmatprep.subr.bf16.mxu0 %v4159_v20  ;;  %v4198_v20 = vld [vmem:[%s5505_s6 + $0x2c4] ss:$8 sps:$4 sm:$0xff]  }
 0x49e   : > { %v2387_v46 = vpop.f32.mrf.mxu0 }
 0x49f   : > { %v2440_v25 = vpop.f32.mrf.mxu1  ;;  %v5264_v4 = vsub.f32 %v2318_v21, %v2387_v46  ;;  %v2497_v42 = vpack.c.bf16 %v5259_v5, %v5249_v8 }
 0x4a0   : > { %3092 = vmatpush1.bf16.msra.mxu0 %v4157_v24  ;;  %v2467_v10 = vsub.f32 %v2440_v25, %v2302_v43  ;;  %v4183_v43 = vld [vmem:[%s5505_s6 + $0x214] ss:$8 sps:$4 sm:$0xff]   ;;  %v4202_v24 = vld [vmem:[%s5505_s6 + $0x2a0] ss:$8 sps:$4 sm:$0xff]   ;;  %v4210_v25 = vld [vmem:[%s5505_s6 + $0x284] ss:$8 sps:$4 sm:$0xff]  }
 0x4a1   : > { %v2442_v13 = vpop.f32.mrf.mxu1  ;;  %v2498_v63 = vpack.c.bf16 %v5264_v4, %v5256_v16  ;;  %3093 = vmatprep.subr.bf16.mxu0 %v4165_v23  ;;  %v4207_v23 = vld [vmem:[%s5505_s6 + $0x294] ss:$8 sps:$4 sm:$0xff]  }
 0x4a2   : > { %v2468_v26 = vsub.f32 %v2442_v13, %v2304_v40  ;;  %v5284_v39 = vsub.f32 %v2467_v10, %v2371_v55 }
 0x4a3   : > { %v2444_v27 = vpop.f32.mrf.mxu1  ;;  %2705 = vmatprep.mubr.bf16.mxu0 %v2498_v63 }
 0x4a4   : > { %v2469_v30 = vsub.f32 %v2444_v27, %v2306_v61  ;;  %2706 = vmatmul.mubr.bf16.gmra.mxu0 %v2497_v42  ;;  %v2476_v12 = vsub.f32 %v2468_v26, %v2373_v56  ;;  %v4208_v42 = vld [vmem:[%s5505_s6 + $0x280] ss:$8 sps:$4 sm:$0xff]   ;;  %v2483_v26 = vadd.f32 %v5284_v39, %v5229_v47 }
 0x4a5   : > { %3094 = vmatpush1.bf16.msra.mxu0 %v4163_v14  ;;  %v2446_v31 = vpop.f32.mrf.mxu1 }
 0x4a6   : > { %v2470_v32 = vsub.f32 %v2446_v31, %v2308_v2  ;;  %3095 = vmatprep.subr.bf16.mxu0 %v4171_v60  ;;  %v5282_v51 = vsub.f32 %v2469_v30, %v2375_v62  ;;  %v2484_v36 = vadd.f32 %v2476_v12, %v2460_v15  ;;  %v4181_v62 = vld [vmem:[%s5505_s6 + $0x210] ss:$8 sps:$4 sm:$0xff]  }
 0x4a7   : > { %v2450_v9 = vpop.f32.mrf.mxu1 }
 0x4a8   : > { %v2478_v38 = vsub.f32 %v2470_v32, %v2377_v6  ;;  %v2471_v48 = vsub.f32 %v2450_v9, %v5227_v52  ;;  %v2499_v57 = vpack.c.bf16 %v5282_v51, %v5284_v39  ;;  %v4186_v6 = vld [vmem:[%s5505_s6 + $0x204] ss:$8 sps:$4 sm:$0xff]   ;;  %v4189_v52 = vld [vmem:[%s5505_s6 + $0x2f4] ss:$8 sps:$4 sm:$0xff]   ;;  %v2485_v13 = vadd.f32 %v5282_v51, %v5225_v1 }
 0x4a9   : > { %3096 = vmatpush1.bf16.msra.mxu0 %v4169_v33  ;;  %v2452_v34 = vpop.f32.mrf.mxu1  ;;  %v5391_v32 = vstv %s489_s30  ;;  %v3167_v51 = vld [vmem:[%s5380_s15 + $0x8] sm:$0xff] }
 0x4aa   : > { %v2486_v35 = vadd.f32 %v2478_v38, %v2462_v19  ;;  %3097 = vmatprep.subr.bf16.mxu0 %v4177_v50  ;;  %v2500_v49 = vpack.c.bf16 %v2478_v38, %v2476_v12  ;;  %v2472_v3 = vsub.f32 %v2452_v34, %v5233_v22  ;;  %v2479_v59 = vsub.f32 %v2471_v48, %v5231_v44  ;;  %v4184_v19 = vld [vmem:[%s5505_s6 + $0x200] ss:$8 sps:$4 sm:$0xff]   ;;  %v4187_v44 = vld [vmem:[%s5505_s6 + $0x2f0] ss:$8 sps:$4 sm:$0xff]  }
 0x4ab   : > { %v2454_v28 = vpop.f32.mrf.mxu1  ;;  %v4190_v22 = vld [vmem:[%s5505_s6 + $0x2e0] ss:$8 sps:$4 sm:$0xff]   ;;  %v2491_v60 = vpack.c.bf16 %v2485_v13, %v2483_v26 }
 0x4ac   : > { %2908 = vmatprep.mubr.bf16.mxu1 %v2500_v49  ;;  %v2492_v53 = vpack.c.bf16 %v2486_v35, %v2484_v36  ;;  %v2473_v29 = vsub.f32 %v2454_v28, %v5245_v11  ;;  %v2480_v55 = vsub.f32 %v2472_v3, %v5243_v18  ;;  %v4196_v18 = vld [vmem:[%s5505_s6 + $0x2c0] ss:$8 sps:$4 sm:$0xff]   ;;  %v4201_v11 = vld [vmem:[%s5505_s6 + $0x2b4] ss:$8 sps:$4 sm:$0xff]   ;;  %v2487_v30 = vadd.f32 %v2479_v59, %v5249_v8 }
 0x4ad   : > { %3098 = vmatpush1.bf16.msra.mxu0 %v4175_v41  ;;  %2909 = vmatmul.mubr.bf16.vlgmr.msra.gmra.mxu1 %v2499_v57  ;;  %v2456_v58 = vpop.f32.mrf.mxu1  ;;  %v3168_v41 = vld [vmem:[%s5380_s15 + $0x10] sm:$0xff] }
 0x4ae   : > { %3099 = vmatprep.subr.bf16.mxu0 %v4180_v54  ;;  %3121 = vmatprep.mubr.bf16.mxu0 %v2492_v53  ;;  %v2481_v40 = vsub.f32 %v2473_v29, %v2385_v7  ;;  %v2474_v56 = vsub.f32 %v2456_v58, %v2318_v21  ;;  %v4199_v7 = vld [vmem:[%s5505_s6 + $0x2b0] ss:$8 sps:$4 sm:$0xff]   ;;  %v4204_v21 = vld [vmem:[%s5505_s6 + $0x2a4] ss:$8 sps:$4 sm:$0xff]   ;;  %v2488_v14 = vadd.f32 %v2480_v55, %v5256_v16 }
 0x4af   : > { %v3169_v54 = vld [vmem:[%s5380_s15 + $0x18] sm:$0xff] }
 0x4b0   : > { %v2482_v61 = vsub.f32 %v2474_v56, %v2387_v46  ;;  %v2501_v2 = vpack.c.bf16 %v2481_v40, %v2479_v59  ;;  %v4205_v46 = vld [vmem:[%s5505_s6 + $0x290] ss:$8 sps:$4 sm:$0xff]   ;;  %v2489_v10 = vadd.f32 %v2481_v40, %v5259_v5  ;;  %v3166_v5 = vld [vmem:[%s5380_s15] sm:$0xff] }
 0x4b1   : > { %3100 = vmatpush1.bf16.msra.mxu0 %v4178_v37  ;;  %v3170_v37 = vld [vmem:[%s5380_s15 + $0x20] sm:$0xff] }
 0x4b2   : > { %3101 = vmatprep.subr.bf16.mxu0 %v4183_v43  ;;  %v2502_v15 = vpack.c.bf16 %v2482_v61, %v2480_v55  ;;  %v2490_v63 = vadd.f32 %v2482_v61, %v5264_v4  ;;  %v2493_v31 = vpack.c.bf16 %v2489_v10, %v2487_v30  ;;  %v3171_v61 = vld [vmem:[%s5380_s15 + $0x28] sm:$0xff] }
 0x4b4   : > { %2918 = vmatprep.mubr.bf16.mxu1 %v2502_v15  ;;  %v2494_v27 = vpack.c.bf16 %v2490_v63, %v2488_v14 }
 0x4b5   : > { %3102 = vmatpush1.bf16.msra.mxu0 %v4181_v62  ;;  %2919 = vmatmul.mubr.bf16.gmra.mxu1 %v2501_v2 }
 0x4b6   : > { %3103 = vmatprep.subr.bf16.mxu0 %v4186_v6 }
 0x4b9   : > { %3104 = vmatpush1.bf16.msra.mxu0 %v4184_v19 }
 0x4ba   : > { %3105 = vmatprep.subr.bf16.mxu0 %v4189_v52  ;;  %v3172_v52 = vld [vmem:[%s5380_s15 + $0x30] sm:$0xff] }
 0x4bd   : > { %3106 = vmatpush2.bf16.msra.mxu0 %v4187_v44 }
 0x4be   : > { %3107 = vmatprep.subr.bf16.mxu0 %v4192_v17 }
 0x4c1   : > { %3108 = vmatpush2.bf16.msra.mxu0 %v4190_v22 }
 0x4c2   : > { %3109 = vmatprep.subr.bf16.mxu0 %v4195_v0 }
 0x4c5   : > { %3110 = vmatpush2.bf16.msra.mxu0 %v4193_v45 }
 0x4c6   : > { %3111 = vmatprep.subr.bf16.mxu0 %v4198_v20 }
 0x4c9   : > { %3112 = vmatpush2.bf16.msra.mxu0 %v4196_v18  ;;  %v3173_v18 = vld [vmem:[%s5380_s15 + $0x38] sm:$0xff] }
 0x4ca   : > { %3113 = vmatprep.subr.bf16.mxu0 %v4201_v11 }
 0x4cd   : > { %3114 = vmatpush2.bf16.msra.mxu0 %v4199_v7 }
 0x4ce   : > { %3115 = vmatprep.subr.bf16.mxu0 %v4204_v21 }
 0x4d1   : > { %3116 = vmatpush2.bf16.msra.mxu0 %v4202_v24 }
 0x4d2   : > { %3117 = vmatprep.subr.bf16.mxu0 %v4207_v23 }
 0x4d5   : > { %3118 = vmatpush2.bf16.msra.mxu0 %v4205_v46 }
 0x4d6   : > { %3119 = vmatprep.subr.bf16.mxu0 %v4210_v25 }
 0x4d9   : > { %3120 = vmatpush2.bf16.msra.mxu0 %v4208_v42 }
 0x4dc   : > { %3122 = vmatmul.mubr.bf16.vlgmr.msra.gmra.mxu0 %v2491_v60  ;;  %v3775_v60 = vld [vmem:[%s5380_s15 + $0x40] sm:$0xff] }
 0x4dd   : > { %3131 = vmatprep.mubr.bf16.mxu0 %v2494_v27 }
 0x4e4   : > { %3132 = vmatmul.mubr.bf16.gmra.mxu0 %v2493_v31  ;;  %v3776_v31 = vld [vmem:[%s5380_s15 + $0x48] sm:$0xff] }
 0x55b   : > { %v5370_v1 = vpop.f32.mrf.mxu0 }
 0x55d   : > { %v5372_v16 = vpop.f32.mrf.mxu0 }
 0x55f   : > { %v5374_v33 = vpop.f32.mrf.mxu0 }
 0x561   : > { %v5382_v47 = vpop.f32.mrf.mxu0 }
 0x564   : > { %v5387_v4 = vpop.f32.mrf.mxu0 }
 0x566   : > { %v5401_v48 = vpop.f32.mrf.mxu0 }
 0x568   : > { %v5421_v59 = vpop.f32.mrf.mxu0 }
 0x56a   : > { %v5437_v44 = vpop.f32.mrf.mxu0 }
 0x56d   : > { %v5384_v8 = vpop.f32.mrf.mxu1 }
 0x56e   : > { %v3142_v12 = vsub.f32 %v5370_v1, %v5384_v8 }
 0x56f   : > { %v5393_v50 = vpop.f32.mrf.mxu1 }
 0x570   : > { %v3183_v9 = vsub.f32 %v3142_v12, %v3166_v5  ;;  %v3143_v38 = vsub.f32 %v5372_v16, %v5393_v50 }
 0x571   : > { %v5398_v39 = vpop.f32.mrf.mxu1 }
 0x572   : > { %v3192_v34 = vmul.f32 %v5391_v32, %v3183_v9  ;;  %v3184_v36 = vsub.f32 %v3143_v38, %v3167_v51  ;;  %v3144_v35 = vsub.f32 %v5374_v33, %v5398_v39  ;;  %v3777_v38 = vld [vmem:[%s5380_s15 + $0x50] sm:$0xff] }
 0x573   : > { %v5412_v49 = vpop.f32.mrf.mxu1 }
 0x574   : > { %v3200_v57 = vadd.f32 %v3192_v34, %v3166_v5  ;;  %v3193_v3 = vmul.f32 %v5391_v32, %v3184_v36  ;;  %v3185_v28 = vsub.f32 %v3144_v35, %v3168_v41  ;;  %v3145_v53 = vsub.f32 %v5382_v47, %v5412_v49 }
 0x575   : > { %v5418_v29 = vpop.f32.mrf.mxu1 }
 0x576   : > { %3208 = vst [vmem:[%s5410_s19] sm:$0xff] %v3200_v57  ;;  %v3201_v58 = vadd.f32 %v3193_v3, %v3167_v51  ;;  %v3194_v43 = vmul.f32 %v5391_v32, %v3185_v28  ;;  %v3186_v55 = vsub.f32 %v3145_v53, %v3169_v54  ;;  %v3146_v40 = vsub.f32 %v5387_v4, %v5418_v29 }
 0x577   : > { %v5427_v56 = vpop.f32.mrf.mxu1 }
 0x578   : > { %3209 = vst [vmem:[%s5410_s19 + $0x8] sm:$0xff] %v3201_v58  ;;  %v3202_v62 = vadd.f32 %v3194_v43, %v3168_v41  ;;  %v3195_v2 = vmul.f32 %v5391_v32, %v3186_v55  ;;  %v3187_v6 = vsub.f32 %v3146_v40, %v3170_v37  ;;  %v3147_v15 = vsub.f32 %v5401_v48, %v5427_v56  ;;  %v3780_v55 = vld [vmem:[%s5380_s15 + $0x68] sm:$0xff] }
 0x579   : > { %v5434_v19 = vpop.f32.mrf.mxu1 }
 0x57a   : > { %3210 = vst [vmem:[%s5410_s19 + $0x10] sm:$0xff] %v3202_v62  ;;  %v3203_v17 = vadd.f32 %v3195_v2, %v3169_v54  ;;  %v3196_v22 = vmul.f32 %v5391_v32, %v3187_v6  ;;  %v3188_v0 = vsub.f32 %v3147_v15, %v3171_v61  ;;  %v3148_v45 = vsub.f32 %v5421_v59, %v5434_v19  ;;  %v3781_v6 = vld [vmem:[%s5380_s15 + $0x70] sm:$0xff] }
 0x57b   : > { %v5443_v20 = vpop.f32.mrf.mxu1 }
 0x57c   : > { %3211 = vst [vmem:[%s5410_s19 + $0x18] sm:$0xff] %v3203_v17  ;;  %v3204_v11 = vadd.f32 %v3196_v22, %v3170_v37  ;;  %v3197_v7 = vmul.f32 %v5391_v32, %v3188_v0  ;;  %v3189_v21 = vsub.f32 %v3148_v45, %v3172_v52  ;;  %v3149_v24 = vsub.f32 %v5437_v44, %v5443_v20  ;;  %v3779_v37 = vld [vmem:[%s5380_s15 + $0x60] sm:$0xff]  ;;  %v3782_v0 = vld [vmem:[%s5380_s15 + $0x78] sm:$0xff] }
 0x57e   : > { %3212 = vst [vmem:[%s5410_s19 + $0x20] sm:$0xff] %v3204_v11  ;;  %v3205_v23 = vadd.f32 %v3197_v7, %v3171_v61  ;;  %v3198_v46 = vmul.f32 %v5391_v32, %v3189_v21  ;;  %v3190_v25 = vsub.f32 %v3149_v24, %v3173_v18 }
 0x580   : > { %3213 = vst [vmem:[%s5410_s19 + $0x28] sm:$0xff] %v3205_v23  ;;  %v3206_v42 = vadd.f32 %v3198_v46, %v3172_v52  ;;  %v3199_v13 = vmul.f32 %v5391_v32, %v3190_v25 }
 0x582   : > { %3214 = vst [vmem:[%s5410_s19 + $0x30] sm:$0xff] %v3206_v42  ;;  %v3207_v14 = vadd.f32 %v3199_v13, %v3173_v18 }
 0x584   : > { %3215 = vst [vmem:[%s5410_s19 + $0x38] sm:$0xff] %v3207_v14 }
 0x59c   : > { %v3123_v63 = vpop.f32.mrf.mxu0 }
 0x59d   : > { %v3150_v26 = vsub.f32 %v3123_v63, %v5370_v1 }
 0x59e   : > { %v3125_v27 = vpop.f32.mrf.mxu0 }
 0x59f   : > { %v3158_v30 = vsub.f32 %v3150_v26, %v5384_v8  ;;  %v3151_v10 = vsub.f32 %v3125_v27, %v5372_v16  ;;  %v3778_v16 = vld [vmem:[%s5380_s15 + $0x58] sm:$0xff] }
 0x5a0   : > { %v3127_v5 = vpop.f32.mrf.mxu0 }
 0x5a1   : > { %v3216_v12 = vsub.f32 %v3158_v30, %v3775_v60  ;;  %v3159_v51 = vsub.f32 %v3151_v10, %v5393_v50  ;;  %v3152_v9 = vsub.f32 %v3127_v5, %v5374_v33 }
 0x5a2   : > { %v3129_v41 = vpop.f32.mrf.mxu0 }
 0x5a3   : > { %v3224_v34 = vmul.f32 %v3216_v12, %v5391_v32  ;;  %v3217_v1 = vsub.f32 %v3159_v51, %v3776_v31  ;;  %v3160_v36 = vsub.f32 %v3152_v9, %v5398_v39  ;;  %v3153_v8 = vsub.f32 %v3129_v41, %v5382_v47 }
 0x5a4   : > { %v3133_v35 = vpop.f32.mrf.mxu0 }
 0x5a5   : > { %v3232_v54 = vadd.f32 %v3775_v60, %v3224_v34  ;;  %v3225_v50 = vmul.f32 %v3217_v1, %v5391_v32  ;;  %v3218_v57 = vsub.f32 %v3160_v36, %v3777_v38  ;;  %v3161_v33 = vsub.f32 %v3153_v8, %v5412_v49 }
 0x5a6   : > { %v3154_v3 = vsub.f32 %v3133_v35, %v5387_v4  ;;  %v3135_v28 = vpop.f32.mrf.mxu0 }
 0x5a7   : > { %3783 = vst [vmem:[%s5410_s19 + $0x40] sm:$0xff] %v3232_v54  ;;  %v3233_v53 = vadd.f32 %v3776_v31, %v3225_v50  ;;  %v3226_v39 = vmul.f32 %v3218_v57, %v5391_v32  ;;  %v3219_v47 = vsub.f32 %v3161_v33, %v3778_v16  ;;  %v3155_v58 = vsub.f32 %v3135_v28, %v5401_v48 }
 0x5a8   : > { %v3162_v43 = vsub.f32 %v3154_v3, %v5418_v29  ;;  %v3137_v40 = vpop.f32.mrf.mxu0 }
 0x5a9   : > { %3784 = vst [vmem:[%s5410_s19 + $0x48] sm:$0xff] %v3233_v53  ;;  %v3234_v49 = vadd.f32 %v3777_v38, %v3226_v39  ;;  %v3227_v4 = vmul.f32 %v3219_v47, %v5391_v32  ;;  %v3163_v61 = vsub.f32 %v3155_v58, %v5427_v56  ;;  %v3156_v62 = vsub.f32 %v3137_v40, %v5421_v59 }
 0x5aa   : > { %v3220_v2 = vsub.f32 %v3162_v43, %v3779_v37  ;;  %v3139_v15 = vpop.f32.mrf.mxu0 }
 0x5ab   : > { %3785 = vst [vmem:[%s5410_s19 + $0x50] sm:$0xff] %v3234_v49  ;;  %v3235_v48 = vadd.f32 %v3778_v16, %v3227_v4  ;;  %v3221_v29 = vsub.f32 %v3163_v61, %v3780_v55  ;;  %v3164_v52 = vsub.f32 %v3156_v62, %v5434_v19  ;;  %v3157_v17 = vsub.f32 %v3139_v15, %v5437_v44 }
 0x5ac   : > { %v3228_v22 = vmul.f32 %v3220_v2, %v5391_v32 }
 0x5ad   : > { %3786 = vst [vmem:[%s5410_s19 + $0x58] sm:$0xff] %v3235_v48  ;;  %v3229_v59 = vmul.f32 %v3221_v29, %v5391_v32  ;;  %v3222_v56 = vsub.f32 %v3164_v52, %v3781_v6  ;;  %v3165_v45 = vsub.f32 %v3157_v17, %v5443_v20 }
 0x5ae   : > { %v3236_v18 = vadd.f32 %v3779_v37, %v3228_v22 }
 0x5af   : > { %v3237_v11 = vadd.f32 %v3780_v55, %v3229_v59  ;;  %v3230_v7 = vmul.f32 %v3222_v56, %v5391_v32  ;;  %v3223_v21 = vsub.f32 %v3165_v45, %v3782_v0 }
 0x5b0   : > { %3787 = vst [vmem:[%s5410_s19 + $0x60] sm:$0xff] %v3236_v18 }
 0x5b1   : > { %3788 = vst [vmem:[%s5410_s19 + $0x68] sm:$0xff] %v3237_v11  ;;  %v3238_v19 = vadd.f32 %v3781_v6, %v3230_v7  ;;  %v3231_v44 = vmul.f32 %v3223_v21, %v5391_v32 }
 0x5b3   : > { %3789 = vst [vmem:[%s5410_s19 + $0x70] sm:$0xff] %v3238_v19  ;;  %v3239_v24 = vadd.f32 %v3782_v0, %v3231_v44 }
 0x5b5   : > { %3790 = vst [vmem:[%s5410_s19 + $0x78] sm:$0xff] %v3239_v24 }
 0x5b6 PF: > { %s25_s23 = sadd.s32 1, %s4255_s23  }
 0x5b7   : > { %p22_p5 = scmp.ge.s32.totalorder %s25_s23, 4  }
 0x5b9   :  { %24 = sbr.rel (!%p22_p5) target bundleno = 4 (0x4), region = 125 }
 0x5be   :  { %3270 = vsyncpa [#allocation4], 1 }
 0x5bf   :  { %3272 = vsyncpa [#allocation4 + $0x1], 1 }
 0x5c0   :  { %3273 = vsyncpa [#allocation6], 1 }

</bundles_post_ra>
